<compile_context>
chip_gen: v7x
topology: tpu7x:2x2x1
jax: 0.10.0
libtpu: 0.0.40
codegen_flags: <defaults>
</compile_context>

<pallas_src>
import functools

import jax
import jax.numpy as jnp
import numpy as np
from jax.experimental import pallas as pl
from jax.experimental.pallas import tpu as pltpu


def _round_up(x, m):
    return ((x + m - 1) // m) * m


def _voxels_kernel(xyz_ref, vox_ref, out_ref, *, nb_voxels, scale):
    xyz = xyz_ref[...]                                    # (3, TN) f32, lane-dense
    x = xyz[0:1, :]
    y = xyz[1:2, :]
    z = xyz[2:3, :]                                       # (1, TN)

    half = scale * 0.5
    cond = (jnp.abs(x) < half) & (jnp.abs(y) < half) & (jnp.abs(z) < half)  # (1, TN)

    inv_step = float(nb_voxels) / float(scale)            # precomputed: no divides
    off = float(nb_voxels // 2)
    vmax = nb_voxels - 1
    # torch .long() truncates toward zero; astype(int32) matches (cond keeps the
    # in-cube values strictly inside [0, V), so trunc == floor where it matters).
    i_x = jnp.clip((x * inv_step + off).astype(jnp.int32), 0, vmax)
    i_y = jnp.clip((y * inv_step + off).astype(jnp.int32), 0, vmax)
    i_z = jnp.clip((z * inv_step + off).astype(jnp.int32), 0, vmax)
    flat = (i_x * nb_voxels + i_y) * nb_voxels + i_z      # (1, TN) int32

    v3 = nb_voxels ** 3
    tn = xyz.shape[1]
    rows = jax.lax.broadcasted_iota(jnp.int32, (v3, tn), 0)
    onehot = jnp.where((rows == flat) & cond, 1.0, 0.0).astype(jnp.float32)  # (V^3, TN)

    # Gather via MXU, lane-dense result: (4, V^3) @ (V^3, TN) -> (4, TN).
    # Out-of-cube points have all-zero one-hot columns -> cd == 0 there (matches
    # torch: zeros written before sigmoid/relu are applied).
    cd = jnp.dot(vox_ref[...], onehot, preferred_element_type=jnp.float32)

    ch = jax.lax.broadcasted_iota(jnp.int32, cd.shape, 0)  # channel index on sublanes
    out_ref[...] = jnp.where(ch < 3, jax.nn.sigmoid(cd), jnp.maximum(cd, 0.0))


def voxels_forward(xyz, voxels, *, scale=1.0, tile_n=512):
    """xyz: (N, 3) f32, voxels: (V, V, V, 4) f32 -> (colors (N, 3), density (N,))."""
    n = xyz.shape[0]
    nb_voxels = voxels.shape[0]
    v3 = nb_voxels ** 3

    # Lane-dense layouts for the kernel.
    xyz_t = jnp.asarray(xyz, jnp.float32).T               # (3, N): points on lanes
    vox_t = jnp.asarray(voxels, jnp.float32).reshape(v3, 4).T  # (4, V^3)

    # Arbitrary N: clamp the tile if N is tiny, then pad N up to a tile multiple.
    tile_n = min(tile_n, _round_up(max(n, 1), 128))
    n_pad = _round_up(max(n, 1), tile_n)
    if n_pad != n:
        # Padded points sit outside the cube (|coord| = scale >= scale/2) -> masked.
        xyz_t = jnp.pad(xyz_t, ((0, 0), (0, n_pad - n)), constant_values=float(scale))

    kernel = functools.partial(_voxels_kernel, nb_voxels=nb_voxels, scale=scale)

    out = pl.pallas_call(
        kernel,
        out_shape=jax.ShapeDtypeStruct((4, n_pad), jnp.float32),
        grid_spec=pltpu.PrefetchScalarGridSpec(
            num_scalar_prefetch=0,
            grid=(n_pad // tile_n,),
            in_specs=[
                pl.BlockSpec((3, tile_n), lambda i: (0, i)),   # points, lane-dense
                pl.BlockSpec((4, v3), lambda i: (0, 0)),       # full table, constant
            ],
            out_specs=pl.BlockSpec((4, tile_n), lambda i: (0, i)),
        ),
        compiler_params=pltpu.CompilerParams(
            dimension_semantics=("parallel",)),                # sharded on v7x megacore
    )(xyz_t, vox_t)

    cd = out[:, :n]
    colors = cd[:3, :].T                                   # (N, 3)
    density = cd[3, :]                                     # (N,)
    return colors, density


def voxels_forward_ref(xyz, voxels, *, scale=1.0):
    """Pure-JAX reference mirroring the torch module."""
    nb_voxels = voxels.shape[0]
    x, y, z = xyz[:, 0], xyz[:, 1], xyz[:, 2]
    half = scale / 2.0
    cond = (jnp.abs(x) < half) & (jnp.abs(y) < half) & (jnp.abs(z) < half)
    step = scale / nb_voxels
    off = nb_voxels // 2
    i_x = jnp.clip((x / step + off).astype(jnp.int32), 0, nb_voxels - 1)
    i_y = jnp.clip((y / step + off).astype(jnp.int32), 0, nb_voxels - 1)
    i_z = jnp.clip((z / step + off).astype(jnp.int32), 0, nb_voxels - 1)
    gathered = voxels[i_x, i_y, i_z, :]                   # (N, 4)
    cd = jnp.where(cond[:, None], gathered, 0.0)
    colors = jax.nn.sigmoid(cd[:, :3])
    density = jnp.maximum(cd[:, 3], 0.0)
    return colors, density


if __name__ == "__main__":
    key = jax.random.PRNGKey(0)
    k_vox, k_xyz = jax.random.split(key)

    nb_voxels = 8          # small synthetic grid (torch default 100 — see TODO above)
    scale = 1.0
    n_points = 2000        # deliberately NOT a multiple of tile_n (exercises padding)

    # Deterministic "parameter" init, analogous to torch.rand(V, V, V, 4).
    voxels = jax.random.uniform(k_vox, (nb_voxels, nb_voxels, nb_voxels, 4),
                                dtype=jnp.float32)
    # Points partially inside / outside the [-scale/2, scale/2]^3 cube.
    xyz = jax.random.uniform(k_xyz, (n_points, 3), dtype=jnp.float32,
                             minval=-0.8, maxval=0.8)
    d = None  # direction argument is unused by the torch forward

    colors, density = voxels_forward(xyz, voxels, scale=scale, tile_n=512)
    jax.block_until_ready((colors, density))

    colors_ref, density_ref = voxels_forward_ref(xyz, voxels, scale=scale)
    np.testing.assert_allclose(np.asarray(colors), np.asarray(colors_ref),
                               rtol=1e-5, atol=1e-5)
    np.testing.assert_allclose(np.asarray(density), np.asarray(density_ref),
                               rtol=1e-5, atol=1e-5)

    print("KERNEL_OK")
</pallas_src>

<mosaic_0001>
module attributes {stable_mosaic.version = 11 : i64} {
  func.func @_voxels_kernel(%arg0: i32, %arg1: memref<3x512xf32, #tpu.memory_space<vmem>>, %arg2: memref<4x512xf32, #tpu.memory_space<vmem>>, %arg3: memref<4x512xf32, #tpu.memory_space<vmem>>) attributes {dimension_semantics = [#tpu.dimension_semantics<parallel>], iteration_bounds = array<i64: 4>, scalar_prefetch = 0 : i64, scratch_operands = 0 : i64, tpu.core_type = #tpu.core_type<tc>, window_params = [{transform_indices = @transform_0, window_bounds = array<i64: 3, 512>}, {pipeline_mode = #tpu.pipeline_mode<synchronous>, transform_indices = @transform_1, window_bounds = array<i64: 4, 512>}, {transform_indices = @transform_2, window_bounds = array<i64: 4, 512>}]} {
    %c0 = arith.constant 0 : index
    %c0_0 = arith.constant 0 : index
    %0 = vector.load %arg1[%c0, %c0_0] : memref<3x512xf32, #tpu.memory_space<vmem>>, vector<3x512xf32>
    %1 = vector.extract_strided_slice %0 {offsets = [0, 0], sizes = [1, 512], strides = [1, 1]} : vector<3x512xf32> to vector<1x512xf32>
    %2 = vector.extract_strided_slice %0 {offsets = [1, 0], sizes = [1, 512], strides = [1, 1]} : vector<3x512xf32> to vector<1x512xf32>
    %3 = vector.extract_strided_slice %0 {offsets = [2, 0], sizes = [1, 512], strides = [1, 1]} : vector<3x512xf32> to vector<1x512xf32>
    %4 = math.absf %1 : vector<1x512xf32>
    %cst = arith.constant 5.000000e-01 : f32
    %5 = vector.broadcast %cst : f32 to vector<1x512xf32>
    %6 = arith.cmpf olt, %4, %5 : vector<1x512xf32>
    %7 = math.absf %2 : vector<1x512xf32>
    %cst_1 = arith.constant 5.000000e-01 : f32
    %8 = vector.broadcast %cst_1 : f32 to vector<1x512xf32>
    %9 = arith.cmpf olt, %7, %8 : vector<1x512xf32>
    %10 = arith.andi %6, %9 : vector<1x512xi1>
    %11 = math.absf %3 : vector<1x512xf32>
    %cst_2 = arith.constant 5.000000e-01 : f32
    %12 = vector.broadcast %cst_2 : f32 to vector<1x512xf32>
    %13 = arith.cmpf olt, %11, %12 : vector<1x512xf32>
    %14 = arith.andi %10, %13 : vector<1x512xi1>
    %cst_3 = arith.constant 8.000000e+00 : f32
    %15 = vector.broadcast %cst_3 : f32 to vector<1x512xf32>
    %16 = arith.mulf %1, %15 : vector<1x512xf32>
    %cst_4 = arith.constant 4.000000e+00 : f32
    %17 = vector.broadcast %cst_4 : f32 to vector<1x512xf32>
    %18 = arith.addf %16, %17 : vector<1x512xf32>
    %19 = arith.fptosi %18 : vector<1x512xf32> to vector<1x512xi32>
    %c0_i32 = arith.constant 0 : i32
    %c7_i32 = arith.constant 7 : i32
    %20 = vector.broadcast %c0_i32 : i32 to vector<1x512xi32>
    %21 = arith.maxsi %20, %19 : vector<1x512xi32>
    %22 = vector.broadcast %c7_i32 : i32 to vector<1x512xi32>
    %23 = arith.minsi %22, %21 : vector<1x512xi32>
    %cst_5 = arith.constant 8.000000e+00 : f32
    %24 = vector.broadcast %cst_5 : f32 to vector<1x512xf32>
    %25 = arith.mulf %2, %24 : vector<1x512xf32>
    %cst_6 = arith.constant 4.000000e+00 : f32
    %26 = vector.broadcast %cst_6 : f32 to vector<1x512xf32>
    %27 = arith.addf %25, %26 : vector<1x512xf32>
    %28 = arith.fptosi %27 : vector<1x512xf32> to vector<1x512xi32>
    %c0_i32_7 = arith.constant 0 : i32
    %c7_i32_8 = arith.constant 7 : i32
    %29 = vector.broadcast %c0_i32_7 : i32 to vector<1x512xi32>
    %30 = arith.maxsi %29, %28 : vector<1x512xi32>
    %31 = vector.broadcast %c7_i32_8 : i32 to vector<1x512xi32>
    %32 = arith.minsi %31, %30 : vector<1x512xi32>
    %cst_9 = arith.constant 8.000000e+00 : f32
    %33 = vector.broadcast %cst_9 : f32 to vector<1x512xf32>
    %34 = arith.mulf %3, %33 : vector<1x512xf32>
    %cst_10 = arith.constant 4.000000e+00 : f32
    %35 = vector.broadcast %cst_10 : f32 to vector<1x512xf32>
    %36 = arith.addf %34, %35 : vector<1x512xf32>
    %37 = arith.fptosi %36 : vector<1x512xf32> to vector<1x512xi32>
    %c0_i32_11 = arith.constant 0 : i32
    %c7_i32_12 = arith.constant 7 : i32
    %38 = vector.broadcast %c0_i32_11 : i32 to vector<1x512xi32>
    %39 = arith.maxsi %38, %37 : vector<1x512xi32>
    %40 = vector.broadcast %c7_i32_12 : i32 to vector<1x512xi32>
    %41 = arith.minsi %40, %39 : vector<1x512xi32>
    %c8_i32 = arith.constant 8 : i32
    %42 = vector.broadcast %c8_i32 : i32 to vector<1x512xi32>
    %43 = arith.muli %23, %42 : vector<1x512xi32>
    %44 = arith.addi %43, %32 : vector<1x512xi32>
    %c8_i32_13 = arith.constant 8 : i32
    %45 = vector.broadcast %c8_i32_13 : i32 to vector<1x512xi32>
    %46 = arith.muli %44, %45 : vector<1x512xi32>
    %47 = arith.addi %46, %41 : vector<1x512xi32>
    %48 = tpu.iota {dimensions = array<i32: 0>} : vector<512x512xi32>
    %49 = vector.broadcast %47 : vector<1x512xi32> to vector<512x512xi32>
    %50 = arith.cmpi eq, %48, %49 : vector<512x512xi32>
    %51 = vector.broadcast %14 : vector<1x512xi1> to vector<512x512xi1>
    %52 = arith.andi %50, %51 : vector<512x512xi1>
    %cst_14 = arith.constant 1.000000e+00 : f32
    %cst_15 = arith.constant 0.000000e+00 : f32
    %53 = vector.broadcast %cst_14 : f32 to vector<512x512xf32>
    %54 = vector.broadcast %cst_15 : f32 to vector<512x512xf32>
    %55 = arith.select %52, %53, %54 : vector<512x512xi1>, vector<512x512xf32>
    %c0_16 = arith.constant 0 : index
    %c0_17 = arith.constant 0 : index
    %56 = vector.load %arg2[%c0_16, %c0_17] : memref<4x512xf32, #tpu.memory_space<vmem>>, vector<4x512xf32>
    %cst_18 = arith.constant dense<0.000000e+00> : vector<4x512xf32>
    %57 = tpu.matmul %56, %55, %cst_18 {dimension_numbers = #tpu.dot_dimension_numbers<[1], [0], [0], [1], [0, 0, 1, 1], [], []>} : vector<4x512xf32>, vector<512x512xf32>, vector<4x512xf32> -> vector<4x512xf32>
    %58 = tpu.iota {dimensions = array<i32: 0>} : vector<4x512xi32>
    %c3_i32 = arith.constant 3 : i32
    %59 = vector.broadcast %c3_i32 : i32 to vector<4x512xi32>
    %60 = arith.cmpi slt, %58, %59 : vector<4x512xi32>
    %61 = arith.negf %57 : vector<4x512xf32>
    %62 = math.exp %61 : vector<4x512xf32>
    %cst_19 = arith.constant 1.000000e+00 : f32
    %63 = vector.broadcast %cst_19 : f32 to vector<4x512xf32>
    %64 = arith.addf %63, %62 : vector<4x512xf32>
    %65 = arith.divf %63, %64 : vector<4x512xf32>
    %cst_20 = arith.constant 0.000000e+00 : f32
    %66 = vector.broadcast %cst_20 : f32 to vector<4x512xf32>
    %67 = arith.maximumf %57, %66 : vector<4x512xf32>
    %68 = arith.select %60, %65, %67 : vector<4x512xi1>, vector<4x512xf32>
    %c0_21 = arith.constant 0 : index
    %c0_22 = arith.constant 0 : index
    %69 = vector.load %arg3[%c0_21, %c0_22] : memref<4x512xf32, #tpu.memory_space<vmem>>, vector<4x512xf32>
    tpu.vector_store %arg3[%c0_21, %c0_22], %68 {strides = array<i32>} : memref<4x512xf32, #tpu.memory_space<vmem>>, vector<4x512xf32>,
    return
  }
  func.func @transform_0(%arg0: i32) -> (i32, i32) {
    %c0_i32 = arith.constant 0 : i32
    %c0_i32_0 = arith.constant 0 : i32
    return %c0_i32, %arg0 : i32, i32
  }
  func.func @transform_1(%arg0: i32) -> (i32, i32) {
    %c0_i32 = arith.constant 0 : i32
    %c0_i32_0 = arith.constant 0 : i32
    %c0_i32_1 = arith.constant 0 : i32
    return %c0_i32, %c0_i32_0 : i32, i32
  }
  func.func @transform_2(%arg0: i32) -> (i32, i32) {
    %c0_i32 = arith.constant 0 : i32
    %c0_i32_0 = arith.constant 0 : i32
    return %c0_i32, %arg0 : i32, i32
  }
}

</mosaic_0001>

<bundles_post_ra>
// kernel: tpu_custom_call.1
= control target key start
LH: loop header
LB: loop body
LE: loop exit
PB: predicated region body
PF: predicated region fallthrough
CT: control target
= control target key end

     0   :  { %7 = vsyncpa [#allocation3], 0  ;;  %s3572_s0 = inlined_call_operand.hbm [shape: f32[3,2048], index: 0, kind: input, shape index: {}]   ;;  %s3573_s1 = inlined_call_operand.hbm [shape: f32[4,512], index: 1, kind: input, shape index: {}]   ;;  %s3574_s2 = inlined_call_operand.hbm [shape: f32[4,2048], index: 2, kind: output, shape index: {}]  }
   0x1   :  { %9 = vsyncpa [#allocation3 + $0x1], 0 }
   0x2   :  { %10 = vsyncpa [#allocation6], 0 }
   0x3   :  { %11 = vsyncpa [#allocation4], 0 }
   0x4   :  { %13 = vsyncpa [#allocation4 + $0x1], 0  ;;  %s2339_s9 = smov 0   ;;  %s2341_s10 = smov 0  }
   0x5   :  { %s2343_s11 = smov 0   ;;  %s2345_s12 = smov 0  }
   0x6 LB: > { %s2360_s13 = sadd.s32 4294967295, %s2317_s12   ;;  %s1562_s14 = sadd.s32 4294967294, %s2317_s12   ;;  %s2317_s12 = sphi %s2345_s12, %s3603_s12   ;;  %s2313_s11 = sphi %s2343_s11, %s3602_s11   ;;  %s2309_s10 = sphi %s2341_s10, %s3601_s10   ;;  %s2305_s9 = sphi %s2339_s9, %s3600_s9  }
   0x7   : > { %p39_p0 = scmp.ne.s32.totalorder %s2309_s10, %s2305_s9  ;;  %p3575_p1 = scmp.eq.s32.totalorder %s2360_s13, 0 }
   0x8   : > { %p90_p3 = scmp.eq.s32.totalorder %s1562_s14, 3  ;;  %p1563_p5 = scmp.ge.s32.totalorder %s2317_s12, 1 }
   0x9   : > { %p2369_p4 = por %p3575_p1, %p39_p0  ;;  %p97_p7 = scmp.lt.s32.totalorder %s2317_s12, 5 }
   0xa   : > { %p2374_p6 = por %p90_p3, %p39_p0  ;;  %s2319_s18 = smov [#allocation5]  }
   0xb   : > { %s3578_s15 = scalar_select %p2369_p4, 1, 0 }
   0xc   : > { %s3579_s16 = scalar_select %p2374_p6, 1, 0 }
   0xd   : > { %p2379_p8 = pnand %p1563_p5, %p97_p7  ;;  %s110_s19 = sshll.u32 %s2319_s18, 4  ;;  %s111_s19 = int_to_ptr.vmem [resolvable:$true] %s110_s19 }
   0xe   : > { %s2386_s20 = sadd.s32 1, %s2317_s12   ;;  %s26_s24 = sadd.s32 1, %s2313_s11 }
   0xf   : > { %s3580_s17 = scalar_select %p2379_p8, 1, 0 }
  0x10   : > { %p2120_p9 = pneg %p2379_p8  ;;  %s23_s22 = ssub.s32 %s2317_s12, %s2386_s20 }
  0x11   : > { %p2396_p11 = scmp.eq.s32.totalorder %s23_s22, 0  ;;  %s2189_s27 = scalar_lea.hbm %s3573_s1, 256 }
  0x12   : > { %p2390_p10 = pnand %p2120_p9, %p3575_p1  ;;  %p2190_p13 = scmp.ne.s32.totalorder %s3573_s1, %s2189_s27 }
  0x13   : > { %s3582_s23 = scalar_select %p2396_p11, 1, 0 }
  0x14   : > { %p2191_p0 = pneg %p2390_p10  ;;  %p2196_p7 = scmp.lt.u32.totalorder %s2189_s27, %s3573_s1 }
  0x16   : > { %p2192_p3 = pnand %p2191_p0, %p2190_p13 }
  0x18   : > { %p2193_p5 = pneg %p2192_p3 }
  0x1a   : > { %p2198_p9 = pnand %p2196_p7, %p2193_p5 }
  0x1c   : > { %2201 = shalt.err (!%p2198_p9)
}
  0x1d   : > { %s2202_s4 = scalar_lea.vmem %s111_s19, 256  ;;  %p2210_p6 = scmp.lt.s32.totalorder %s111_s19, %s111_s19 }
  0x1e   : > { %p2203_p1 = scmp.ne.s32.totalorder %s111_s19, %s2202_s4  ;;  %p2211_p4 = scmp.lt.s32.totalorder %s2202_s4, %s2202_s4 }
  0x20   : > { %p2205_p2 = pnand %p2203_p1, %p2191_p0  ;;  %p2212_p8 = por %p2211_p4, %p2210_p6 }
  0x22   : > { %p2206_p12 = pneg %p2205_p2 }
  0x24   : > { %p2213_p11 = pnand %p2212_p8, %p2206_p12 }
  0x26   : > { %2216 = shalt.err (!%p2213_p11)
}
  0x27   : > { %2123 = dma.hbm_to_vmem [thread:$0]  (!%p2390_p10), %s3573_s1, 256, %s111_s19, [#allocation6]  }
  0x28   : > { %p3583_p1 = scmp.ne.s32.totalorder %s3582_s23, 0  ;;  %p34_p2 = scmp.eq.s32.totalorder %s2317_s12, 0 }
  0x29   : > { %p3584_p4 = scmp.ne.s32.totalorder %s2313_s11, %s2309_s10  ;;  %p3585_p6 = scmp.eq.s32.totalorder %s2360_s13, 3 }
  0x2a   : > { %s2422_s7 = scalar_select %p3583_p1, %s2313_s11, %s26_s24  }
  0x2b   : > { %p2430_p8 = por %p3585_p6, %p3584_p4  ;;  %p2133_p11 = scmp.lt.s32.totalorder %s2317_s12, 4 }
  0x2c   : > { %s121_s14 = sand.u32 1, %s2313_s11   ;;  %p3587_p12 = pmov %p3584_p4 }
  0x2d   : > { %s1566_s18 = sshll.u32 %s121_s14, 4  ;;  %s1846_s21 = sshll.u32 %s2317_s12, 8 }
  0x2e   : > { %p35_p13 = por %p34_p2, %p3587_p12  ;;  %s2443_s19 = scalar_lea.hbm %s3572_s0, %s1846_s21 }
  0x2f   : > { %s125_s23 = scalar_lea.vmem [#allocation2], %s1566_s18  ;;  %s122_s27 = scalar_lea.sflag [#allocation3], %s121_s14 }
  0x30   : > { %s133_s24 = sshll.u32 %s125_s23, 4  ;;  %p2445_p10 = pnand %p2133_p11, %p35_p13  ;;  %s2449_s24 = int_to_ptr.vmem [resolvable:$true] %s133_s24 }
  0x31   : > { %s2217_s28 = scalar_lea.hbm %s2443_s19, 256  ;;  %s2222_s3 = scalar_lea.hbm %s3572_s0, 1024 }
  0x32   : > { %p2218_p0 = scmp.ne.s32.totalorder %s2443_s19, %s2217_s28  ;;  %p2219_p3 = pneg %p2445_p10 }
  0x33   : > { %p2223_p9 = scmp.lt.u32.totalorder %s2443_s19, %s3572_s0  ;;  %p2224_p1 = scmp.lt.u32.totalorder %s2222_s3, %s2217_s28 }
  0x34   : > { %p2220_p5 = pnand %p2219_p3, %p2218_p0  ;;  %p2226_p4 = scmp.lt.u32.totalorder %s2217_s28, %s2443_s19 }
  0x35   : > { %p2225_p2 = por %p2224_p1, %p2223_p9 }
  0x36   : > { %p2221_p7 = pneg %p2220_p5 }
  0x37   : > { %p2227_p6 = por %p2226_p4, %p2225_p2 }
  0x39   : > { %p2228_p11 = pnand %p2227_p6, %p2221_p7 }
  0x3b   : > { %2231 = shalt.err (!%p2228_p11)
}
  0x3c   : > { %s2232_s6 = scalar_lea.vmem %s2449_s24, 256  ;;  %s2320_s14 = smov [#allocation2]  }
  0x3d   : > { %p2233_p12 = scmp.ne.s32.totalorder %s2449_s24, %s2232_s6  ;;  %s2237_s18 = sshll.u32 %s2320_s14, 4  ;;  %s2238_s18 = int_to_ptr.vmem [resolvable:$false] %s2237_s18 }
  0x3e   : > { %s2239_s21 = scalar_lea.vmem %s2238_s18, 512  ;;  %p2240_p5 = scmp.lt.s32.totalorder %s2449_s24, %s2238_s18 }
  0x3f   : > { %p2235_p13 = pnand %p2233_p12, %p2219_p3  ;;  %p2241_p9 = scmp.lt.s32.totalorder %s2239_s21, %s2232_s6 }
  0x41   : > { %p2236_p0 = pneg %p2235_p13  ;;  %p2242_p1 = por %p2241_p9, %p2240_p5 }
  0x43   : > { %p2243_p2 = pnand %p2242_p1, %p2236_p0 }
  0x45   : > { %2246 = shalt.err (!%p2243_p2)
}
  0x46   : > { %2127 = dma.hbm_to_vmem [thread:$0]  (!%p2445_p10), %s2443_s19, 256, %s2449_s24, %s122_s27  }
  0x47   : > { %p3589_p7 = scmp.ne.s32.totalorder %s3580_s17, 0 }
  0x48   : > { %s2479_s22 = sand.u32 (!%p3589_p7), 1, %s2309_s10   ;;  %p3590_p3 = scmp.ne.s32.totalorder (!%p3589_p7), %s3578_s15, 0 }
  0x49   : > { %142 = sbr.rel (%p3589_p7) target bundleno = 754 (0x2f2), region = 28  ;;  %s1570_s25 = sshll.u32 (!%p3589_p7), %s2479_s22, 4 }
  0x4a   : > { %s145_s23 = scalar_lea.sflag (!%p3589_p7), [#allocation3], %s2479_s22  ;;  %s148_s28 = scalar_lea.vmem (!%p3589_p7), [#allocation2], %s1570_s25 }
  0x50   : > { %2292 = dma.done.wait (%p3590_p3), %s145_s23, 256  }
  0x51   : > { %2294 = vsyncadd (%p3590_p3), %s145_s23, 4294967040  ;;  %p3591_p10 = scmp.eq.s32.totalorder %s2360_s13, 0 }
  0x53   : > { %2296 = dma.done.wait (%p3591_p10), [#allocation6], 256   ;;  %p3592_p4 = pmov %p3591_p10 }
  0x54   : > { %v175_v0 = vld [vmem:[%s148_s28] sm:$0x77]  ;;  %v176_v1 = vld [vmem:[%s148_s28 + $0x8] sm:$0x77]  ;;  %v229_v6 = vlaneseq  ;;  %v2321_v11 = vmov 0   ;;  %s1847_s15 = sshll.u32 %s2360_s13, 8 }
  0x55   : > { %2298 = vsyncadd (%p3592_p4), [#allocation6], 4294967040  ;;  %v177_v2 = vand.u32 2147483647, %v175_v0  ;;  %v178_v3 = vand.u32 2147483647, %v176_v1  ;;  %s3529_s27 = scalar_lea.hbm %s3574_s2, %s1847_s15 }
  0x56   : > { %v199_v4 = vmul.f32 8.0, %v175_v0  ;;  %v200_v5 = vmul.f32 8.0, %v176_v1  ;;  %v2509_v21 = vshrl.u32 %v229_v6, 7  ;;  %v2322_v61 = vmov 1.0|1.0   ;;  %v2709_v8 = vld [vmem:[#allocation5] sm:$0xff] }
  0x57   : > { %vm2493_vm0 = vcmp.lt.f32.partialorder %v177_v2, 0.5  ;;  %vm2497_vm1 = vcmp.lt.f32.partialorder %v178_v3, 0.5  ;;  %s172_s17 = scalar_lea.vmem [#allocation7], %s1570_s25  ;;  %s1468_s13 = scalar_lea.sflag [#allocation4], %s2479_s22 }
  0x58   : > { %v201_v9 = vadd.f32 4.0, %v199_v4  ;;  %v202_v10 = vadd.f32 4.0, %v200_v5  ;;  %v181_v12 = vsel %vm2493_vm0, 1, %v2321_v11  ;;  %v182_v13 = vsel %vm2497_vm1, 1, %v2321_v11  ;;  %s1482_s19 = sshll.u32 %s172_s17, 4  ;;  %s2323_s30 = smov [#allocation7]   ;;  %s3531_s19 = int_to_ptr.vmem [resolvable:$true] %s1482_s19 }
  0x59   : > { %v1573_v14 = vrot.slane %v181_v12, 9  ;;  %v1574_v15 = vrot.slane %v182_v13, 9  ;;  %v1575_v16 = vrot.slane %v181_v12, 10  ;;  %v1576_v17 = vrot.slane %v182_v13, 10  ;;  %s2247_s29 = scalar_lea.vmem %s3531_s19, 256  ;;  %s2251_s3 = sshll.u32 %s2323_s30, 4  ;;  %s2252_s3 = int_to_ptr.vmem [resolvable:$false] %s2251_s3 }
  0x5a   : > { %v2108_v18 = vtrunc.f32 %v201_v9  ;;  %v2110_v19 = vtrunc.f32 %v202_v10  ;;  %v300_v26 = vsub.s32 4, %v2509_v21  ;;  %v296_v34 = vsub.s32 0, %v2509_v21  ;;  %p2248_p6 = scmp.ne.s32.totalorder %s3531_s19, %s2247_s29  ;;  %s2253_s4 = scalar_lea.vmem %s2252_s3, 512 }
  0x5b   : > { %vm187_vm2 = vcmp.ne.s32.totalorder %v1573_v14, 0  ;;  %vm2505_vm3 = vcmp.ne.s32.totalorder %v1574_v15, 0  ;;  %vm195_vm4 = vcmp.ne.s32.totalorder %v1575_v16, 0  ;;  %vm196_vm7 = vcmp.ne.s32.totalorder %v1576_v17, 0  ;;  %p2254_p13 = scmp.lt.s32.totalorder %s3531_s19, %s2252_s3  ;;  %p2255_p0 = scmp.lt.s32.totalorder %s2253_s4, %s2247_s29 }
  0x5c   : > { %vm189_vm5 = vmand %vm2493_vm0, %vm187_vm2  ;;  %v2109_v22 = vcvt.f32.s32 %v2108_v18  ;;  %v2111_v23 = vcvt.f32.s32 %v2110_v19  ;;  %v231_v47 = vadd.s32 8, %v2509_v21  ;;  %v232_v62 = vadd.s32 16, %v2509_v21  ;;  %p2249_p11 = pnand %p2248_p6, %p2430_p8 }
  0x5d   : > { %vm190_vm6 = vmand %vm2497_vm1, %vm2505_vm3  ;;  %v233_v63 = vadd.s32 24, %v2509_v21  ;;  %v234_v0 = vadd.s32 32, %v2509_v21  ;;  %v235_v1 = vadd.s32 40, %v2509_v21  ;;  %v236_v2 = vadd.s32 48, %v2509_v21  ;;  %p2256_p5 = por %p2255_p0, %p2254_p13 }
  0x5e   : > { %vm197_vm8 = vmand %vm189_vm5, %vm195_vm4  ;;  %vm205_vm9 = vcmp.gt.s32.totalorder %v2109_v22, 0  ;;  %vm207_vm10 = vcmp.gt.s32.totalorder %v2111_v23, 0  ;;  %v237_v3 = vadd.s32 56, %v2509_v21  ;;  %v238_v4 = vadd.s32 64, %v2509_v21  ;;  %p2250_p12 = pneg %p2249_p11 }
  0x5f   : > { %v206_v24 = vsel %vm205_vm9, %v2109_v22, 0  ;;  %v208_v25 = vsel %vm207_vm10, %v2111_v23, 0  ;;  %vm198_vm11 = vmand %vm190_vm6, %vm196_vm7  ;;  %v582_v27 = vsel %vm197_vm8, 1, %v2321_v11  ;;  %v239_v5 = vadd.s32 72, %v2509_v21 }
  0x60   : > { %vm209_vm12 = vcmp.lt.s32.totalorder %v206_v24, 7  ;;  %vm211_vm13 = vcmp.lt.s32.totalorder %v208_v25, 7  ;;  %v583_v35 = vsel %vm198_vm11, 1, %v2321_v11  ;;  %v591_v36 = vrot.slane %v582_v27, %v300_v26  ;;  %p2257_p9 = pnand %p2256_p5, %p2250_p12 }
  0x61   : > { %v210_v28 = vsel %vm209_vm12, %v206_v24, 7  ;;  %v212_v29 = vsel %vm211_vm13, %v208_v25, 7  ;;  %v599_v43 = vrot.slane %v583_v35, %v300_v26  ;;  %v587_v51 = vrot.slane %v582_v27, %v296_v34 }
  0x62   : > { %v213_v30 = vmul.u32 8, %v210_v28  ;;  %v214_v31 = vmul.u32 8, %v212_v29  ;;  %v1577_v32 = vrot.slane %v210_v28, 9  ;;  %v1578_v33 = vrot.slane %v212_v29, 9 }
  0x63   : > { %v1579_v39 = vrot.slane %v210_v28, 10  ;;  %v1580_v40 = vrot.slane %v212_v29, 10  ;;  %v2519_v46 = vrot.slane %v591_v36, %v296_v34  ;;  %v2522_v52 = vrot.slane %v599_v43, %v296_v34  ;;  %v3192_v43 = vld [vmem:[#allocation5 + $0x8] sm:$0xff] }
  0x64   : > { %v219_v37 = vadd.s32 %v1577_v32, %v213_v30  ;;  %v220_v38 = vadd.s32 %v1578_v33, %v214_v31  ;;  %v595_v56 = vrot.slane %v583_v35, %v296_v34  ;;  %v2531_v58 = vrot.slane %v587_v51, %v296_v34 }
  0x65   : > { %vm617_vm14 = vcmp.eq.s32.totalorder %v2519_v46, 1  ;;  %vm619_vm1 = vcmp.eq.s32.totalorder %v2522_v52, 1  ;;  %v240_v6 = vadd.s32 80, %v2509_v21  ;;  %v241_v7 = vadd.s32 88, %v2509_v21 }
  0x66   : > { %v221_v41 = vmul.u32 8, %v219_v37  ;;  %v222_v42 = vmul.u32 8, %v220_v38  ;;  %v2546_v60 = vrot.slane %v595_v56, %v296_v34  ;;  %vm616_vm7 = vcmp.eq.s32.totalorder %v2531_v58, 1 }
  0x67   : > { %v242_v9 = vadd.s32 96, %v2509_v21  ;;  %v1136_v10 = vcombine.high %v2709_v8, %v2709_v8  ;;  %v243_v11 = vadd.s32 104, %v2509_v21  ;;  %v244_v12 = vadd.s32 112, %v2509_v21 }
  0x68   : > { %v227_v44 = vadd.s32 %v1579_v39, %v221_v41  ;;  %v228_v45 = vadd.s32 %v1580_v40, %v222_v42  ;;  %vm618_vm13 = vcmp.eq.s32.totalorder %v2546_v60, 1  ;;  %v245_v13 = vadd.s32 120, %v2509_v21 }
  0x69   : > { %1204 = vmatprep.mubr.f32.mxu0 %v1136_v10  ;;  %1346 = vmatprep.mubr.f32.mxu1 %v1136_v10  ;;  %v246_v14 = vadd.s32 128, %v2509_v21  ;;  %v247_v15 = vadd.s32 136, %v2509_v21  ;;  %v248_v16 = vadd.s32 144, %v2509_v21  ;;  %v249_v17 = vadd.s32 152, %v2509_v21 }
  0x6a   : > { %v297_v48 = vrot.slane %v227_v44, %v296_v34  ;;  %v301_v49 = vrot.slane %v227_v44, %v300_v26  ;;  %v309_v50 = vrot.slane %v228_v45, %v300_v26  ;;  %v305_v55 = vrot.slane %v228_v45, %v296_v34 }
  0x6b   : > { %v250_v18 = vadd.s32 160, %v2509_v21  ;;  %v251_v19 = vadd.s32 168, %v2509_v21  ;;  %v252_v20 = vadd.s32 176, %v2509_v21  ;;  %v253_v22 = vadd.s32 184, %v2509_v21 }
  0x6c   : > { %v2524_v53 = vrot.slane %v301_v49, %v296_v34  ;;  %v2526_v54 = vrot.slane %v309_v50, %v296_v34  ;;  %v2529_v57 = vrot.slane %v297_v48, %v296_v34  ;;  %v2544_v59 = vrot.slane %v305_v55, %v296_v34 }
  0x6d   : > { %v254_v23 = vadd.s32 192, %v2509_v21  ;;  %v255_v24 = vadd.s32 200, %v2509_v21  ;;  %v256_v25 = vadd.s32 208, %v2509_v21  ;;  %v257_v26 = vadd.s32 216, %v2509_v21 }
  0x6e   : > { %vm327_vm15 = vcmp.eq.s32.totalorder %v2509_v21, %v2524_v53  ;;  %vm331_vm0 = vcmp.eq.s32.totalorder %v231_v47, %v2524_v53  ;;  %vm329_vm3 = vcmp.eq.s32.totalorder %v2509_v21, %v2526_v54  ;;  %vm333_vm5 = vcmp.eq.s32.totalorder %v231_v47, %v2526_v54 }
  0x6f   : > { %vm621_vm2 = vmand %vm327_vm15, %vm617_vm14  ;;  %vm326_vm9 = vcmp.eq.s32.totalorder %v2509_v21, %v2529_v57  ;;  %vm330_vm11 = vcmp.eq.s32.totalorder %v231_v47, %v2529_v57  ;;  %v258_v27 = vadd.s32 224, %v2509_v21  ;;  %v259_v28 = vadd.s32 232, %v2509_v21 }
  0x70   : > { %vm625_vm4 = vmand %vm331_vm0, %vm617_vm14  ;;  %vm328_vm0 = vcmp.eq.s32.totalorder %v2509_v21, %v2544_v59  ;;  %v260_v29 = vadd.s32 240, %v2509_v21  ;;  %v261_v30 = vadd.s32 248, %v2509_v21  ;;  %v262_v31 = vadd.s32 256, %v2509_v21 }
  0x71   : > { %vm1848_vm6 = vmpackc.low %vm625_vm4, %vm621_vm2  ;;  %v263_v32 = vadd.s32 264, %v2509_v21  ;;  %v264_v33 = vadd.s32 272, %v2509_v21  ;;  %v265_v34 = vadd.s32 280, %v2509_v21  ;;  %v266_v35 = vadd.s32 288, %v2509_v21 }
  0x72   : > { %1849 = vmatprep.subr.msk.bf16.mxu0 %vm1848_vm6, %v2322_v61  ;;  %vm623_vm8 = vmand %vm329_vm3, %vm619_vm1  ;;  %vm332_vm3 = vcmp.eq.s32.totalorder %v231_v47, %v2544_v59  ;;  %vm335_vm6 = vcmp.eq.s32.totalorder %v232_v62, %v2524_v53  ;;  %v267_v36 = vadd.s32 296, %v2509_v21  ;;  %v268_v37 = vadd.s32 304, %v2509_v21 }
  0x73   : > { %vm627_vm10 = vmand %vm333_vm5, %vm619_vm1  ;;  %v269_v38 = vadd.s32 312, %v2509_v21  ;;  %v270_v39 = vadd.s32 320, %v2509_v21  ;;  %v271_v40 = vadd.s32 328, %v2509_v21  ;;  %v272_v41 = vadd.s32 336, %v2509_v21 }
  0x74   : > { %vm1976_vm12 = vmpackc.low %vm627_vm10, %vm623_vm8  ;;  %v273_v42 = vadd.s32 344, %v2509_v21  ;;  %v1137_v44 = vcombine.high %v3192_v43, %v3192_v43  ;;  %v274_v45 = vadd.s32 352, %v2509_v21  ;;  %v275_v47 = vadd.s32 360, %v2509_v21 }
  0x75   : > { %1977 = vmatprep.subr.msk.bf16.mxu1 %vm1976_vm12, %v2322_v61  ;;  %vm620_vm15 = vmand %vm326_vm9, %vm616_vm7  ;;  %vm339_vm9 = vcmp.eq.s32.totalorder %v233_v63, %v2524_v53  ;;  %vm337_vm12 = vcmp.eq.s32.totalorder %v232_v62, %v2526_v54  ;;  %v276_v48 = vadd.s32 368, %v2509_v21  ;;  %v277_v49 = vadd.s32 376, %v2509_v21 }
  0x76   : > { %vm624_vm2 = vmand %vm330_vm11, %vm616_vm7  ;;  %v278_v50 = vadd.s32 384, %v2509_v21  ;;  %v279_v51 = vadd.s32 392, %v2509_v21  ;;  %v280_v55 = vadd.s32 400, %v2509_v21  ;;  %v281_v56 = vadd.s32 408, %v2509_v21 }
  0x77   : > { %vm1850_vm4 = vmpackc.low %vm624_vm2, %vm620_vm15 }
  0x78   : > { %1851 = vmatpush1.bf16.msk.msra.mxu0 %vm1850_vm4, %v2322_v61  ;;  %vm622_vm5 = vmand %vm328_vm0, %vm618_vm13  ;;  %vm341_vm0 = vcmp.eq.s32.totalorder %v233_v63, %v2526_v54  ;;  %vm334_vm4 = vcmp.eq.s32.totalorder %v232_v62, %v2529_v57 }
  0x79   : > { %vm626_vm8 = vmand %vm332_vm3, %vm618_vm13 }
  0x7a   : > { %vm1978_vm10 = vmpackc.low %vm626_vm8, %vm622_vm5 }
  0x7b   : > { %1979 = vmatpush1.bf16.msk.msra.mxu1 %vm1978_vm10, %v2322_v61  ;;  %vm629_vm11 = vmand %vm335_vm6, %vm617_vm14  ;;  %vm338_vm6 = vcmp.eq.s32.totalorder %v233_v63, %v2529_v57  ;;  %vm336_vm10 = vcmp.eq.s32.totalorder %v232_v62, %v2544_v59  ;;  %v282_v62 = vadd.s32 416, %v2509_v21 }
  0x7c   : > { %vm633_vm15 = vmand %vm339_vm9, %vm617_vm14 }
  0x7d   : > { %vm1852_vm2 = vmpackc.low %vm633_vm15, %vm629_vm11 }
  0x7e   : > { %1853 = vmatprep.subr.msk.bf16.mxu0 %vm1852_vm2, %v2322_v61  ;;  %vm631_vm3 = vmand %vm337_vm12, %vm619_vm1  ;;  %vm340_vm12 = vcmp.eq.s32.totalorder %v233_v63, %v2544_v59  ;;  %vm343_vm2 = vcmp.eq.s32.totalorder %v234_v0, %v2524_v53  ;;  %v283_v63 = vadd.s32 424, %v2509_v21 }
  0x7f   : > { %vm635_vm5 = vmand %vm341_vm0, %vm619_vm1 }
  0x80   : > { %vm1980_vm8 = vmpackc.low %vm635_vm5, %vm631_vm3 }
  0x81   : > { %1981 = vmatprep.subr.msk.bf16.mxu1 %vm1980_vm8, %v2322_v61  ;;  %vm628_vm9 = vmand %vm334_vm4, %vm616_vm7  ;;  %vm347_vm4 = vcmp.eq.s32.totalorder %v235_v1, %v2524_v53  ;;  %vm345_vm8 = vcmp.eq.s32.totalorder %v234_v0, %v2526_v54 }
  0x82   : > { %vm632_vm11 = vmand %vm338_vm6, %vm616_vm7 }
  0x83   : > { %vm1854_vm15 = vmpackc.low %vm632_vm11, %vm628_vm9 }
  0x84   : > { %1855 = vmatpush1.bf16.msk.msra.mxu0 %vm1854_vm15, %v2322_v61  ;;  %vm630_vm0 = vmand %vm336_vm10, %vm618_vm13  ;;  %vm349_vm10 = vcmp.eq.s32.totalorder %v235_v1, %v2526_v54  ;;  %vm342_vm15 = vcmp.eq.s32.totalorder %v234_v0, %v2529_v57 }
  0x85   : > { %vm634_vm3 = vmand %vm340_vm12, %vm618_vm13 }
  0x86   : > { %vm1982_vm5 = vmpackc.low %vm634_vm3, %vm630_vm0 }
  0x87   : > { %1983 = vmatpush1.bf16.msk.msra.mxu1 %vm1982_vm5, %v2322_v61  ;;  %vm637_vm6 = vmand %vm343_vm2, %vm617_vm14  ;;  %vm346_vm2 = vcmp.eq.s32.totalorder %v235_v1, %v2529_v57  ;;  %vm344_vm5 = vcmp.eq.s32.totalorder %v234_v0, %v2544_v59  ;;  %v284_v0 = vadd.s32 432, %v2509_v21 }
  0x88   : > { %vm641_vm9 = vmand %vm347_vm4, %vm617_vm14 }
  0x89   : > { %vm1856_vm11 = vmpackc.low %vm641_vm9, %vm637_vm6 }
  0x8a   : > { %1857 = vmatprep.subr.msk.bf16.mxu0 %vm1856_vm11, %v2322_v61  ;;  %vm639_vm12 = vmand %vm345_vm8, %vm619_vm1  ;;  %vm348_vm8 = vcmp.eq.s32.totalorder %v235_v1, %v2544_v59  ;;  %vm351_vm11 = vcmp.eq.s32.totalorder %v236_v2, %v2524_v53  ;;  %v285_v1 = vadd.s32 440, %v2509_v21 }
  0x8b   : > { %vm643_vm0 = vmand %vm349_vm10, %vm619_vm1 }
  0x8c   : > { %vm1984_vm3 = vmpackc.low %vm643_vm0, %vm639_vm12 }
  0x8d   : > { %1985 = vmatprep.subr.msk.bf16.mxu1 %vm1984_vm3, %v2322_v61  ;;  %vm636_vm4 = vmand %vm342_vm15, %vm616_vm7  ;;  %vm355_vm15 = vcmp.eq.s32.totalorder %v237_v3, %v2524_v53  ;;  %vm353_vm3 = vcmp.eq.s32.totalorder %v236_v2, %v2526_v54 }
  0x8e   : > { %vm640_vm6 = vmand %vm346_vm2, %vm616_vm7 }
  0x8f   : > { %vm1858_vm9 = vmpackc.low %vm640_vm6, %vm636_vm4 }
  0x90   : > { %1859 = vmatpush1.bf16.msk.msra.mxu0 %vm1858_vm9, %v2322_v61  ;;  %vm638_vm10 = vmand %vm344_vm5, %vm618_vm13  ;;  %vm357_vm5 = vcmp.eq.s32.totalorder %v237_v3, %v2526_v54  ;;  %vm350_vm9 = vcmp.eq.s32.totalorder %v236_v2, %v2529_v57 }
  0x91   : > { %vm642_vm12 = vmand %vm348_vm8, %vm618_vm13 }
  0x92   : > { %vm1986_vm0 = vmpackc.low %vm642_vm12, %vm638_vm10 }
  0x93   : > { %1987 = vmatpush1.bf16.msk.msra.mxu1 %vm1986_vm0, %v2322_v61  ;;  %vm645_vm2 = vmand %vm351_vm11, %vm617_vm14  ;;  %vm354_vm11 = vcmp.eq.s32.totalorder %v237_v3, %v2529_v57  ;;  %vm352_vm0 = vcmp.eq.s32.totalorder %v236_v2, %v2544_v59  ;;  %v286_v2 = vadd.s32 448, %v2509_v21 }
  0x94   : > { %vm649_vm4 = vmand %vm355_vm15, %vm617_vm14 }
  0x95   : > { %vm1860_vm6 = vmpackc.low %vm649_vm4, %vm645_vm2 }
  0x96   : > { %1861 = vmatprep.subr.msk.bf16.mxu0 %vm1860_vm6, %v2322_v61  ;;  %vm647_vm8 = vmand %vm353_vm3, %vm619_vm1  ;;  %vm356_vm3 = vcmp.eq.s32.totalorder %v237_v3, %v2544_v59  ;;  %vm359_vm6 = vcmp.eq.s32.totalorder %v238_v4, %v2524_v53  ;;  %v287_v3 = vadd.s32 456, %v2509_v21 }
  0x97   : > { %vm651_vm10 = vmand %vm357_vm5, %vm619_vm1 }
  0x98   : > { %vm1988_vm12 = vmpackc.low %vm651_vm10, %vm647_vm8 }
  0x99   : > { %1989 = vmatprep.subr.msk.bf16.mxu1 %vm1988_vm12, %v2322_v61  ;;  %vm644_vm15 = vmand %vm350_vm9, %vm616_vm7  ;;  %vm363_vm9 = vcmp.eq.s32.totalorder %v239_v5, %v2524_v53  ;;  %vm361_vm12 = vcmp.eq.s32.totalorder %v238_v4, %v2526_v54 }
  0x9a   : > { %vm648_vm2 = vmand %vm354_vm11, %vm616_vm7 }
  0x9b   : > { %vm1862_vm4 = vmpackc.low %vm648_vm2, %vm644_vm15 }
  0x9c   : > { %1863 = vmatpush1.bf16.msk.msra.mxu0 %vm1862_vm4, %v2322_v61  ;;  %vm646_vm5 = vmand %vm352_vm0, %vm618_vm13  ;;  %vm365_vm0 = vcmp.eq.s32.totalorder %v239_v5, %v2526_v54  ;;  %vm358_vm4 = vcmp.eq.s32.totalorder %v238_v4, %v2529_v57 }
  0x9d   : > { %vm650_vm8 = vmand %vm356_vm3, %vm618_vm13 }
  0x9e   : > { %vm1990_vm10 = vmpackc.low %vm650_vm8, %vm646_vm5 }
  0x9f   : > { %1991 = vmatpush1.bf16.msk.msra.mxu1 %vm1990_vm10, %v2322_v61  ;;  %vm653_vm11 = vmand %vm359_vm6, %vm617_vm14  ;;  %vm362_vm6 = vcmp.eq.s32.totalorder %v239_v5, %v2529_v57  ;;  %vm360_vm10 = vcmp.eq.s32.totalorder %v238_v4, %v2544_v59  ;;  %v288_v4 = vadd.s32 464, %v2509_v21 }
  0xa0   : > { %vm657_vm15 = vmand %vm363_vm9, %vm617_vm14 }
  0xa1   : > { %vm1864_vm2 = vmpackc.low %vm657_vm15, %vm653_vm11 }
  0xa2   : > { %1865 = vmatprep.subr.msk.bf16.mxu0 %vm1864_vm2, %v2322_v61  ;;  %vm655_vm3 = vmand %vm361_vm12, %vm619_vm1  ;;  %vm364_vm12 = vcmp.eq.s32.totalorder %v239_v5, %v2544_v59  ;;  %vm367_vm2 = vcmp.eq.s32.totalorder %v240_v6, %v2524_v53  ;;  %v289_v5 = vadd.s32 472, %v2509_v21 }
  0xa3   : > { %vm659_vm5 = vmand %vm365_vm0, %vm619_vm1 }
  0xa4   : > { %vm1992_vm8 = vmpackc.low %vm659_vm5, %vm655_vm3 }
  0xa5   : > { %1993 = vmatprep.subr.msk.bf16.mxu1 %vm1992_vm8, %v2322_v61  ;;  %vm652_vm9 = vmand %vm358_vm4, %vm616_vm7  ;;  %vm371_vm4 = vcmp.eq.s32.totalorder %v241_v7, %v2524_v53  ;;  %vm369_vm8 = vcmp.eq.s32.totalorder %v240_v6, %v2526_v54 }
  0xa6   : > { %vm656_vm11 = vmand %vm362_vm6, %vm616_vm7 }
  0xa7   : > { %vm1866_vm15 = vmpackc.low %vm656_vm11, %vm652_vm9 }
  0xa8   : > { %1867 = vmatpush1.bf16.msk.msra.mxu0 %vm1866_vm15, %v2322_v61  ;;  %vm654_vm0 = vmand %vm360_vm10, %vm618_vm13  ;;  %vm373_vm10 = vcmp.eq.s32.totalorder %v241_v7, %v2526_v54  ;;  %vm366_vm15 = vcmp.eq.s32.totalorder %v240_v6, %v2529_v57 }
  0xa9   : > { %vm658_vm3 = vmand %vm364_vm12, %vm618_vm13 }
  0xaa   : > { %vm1994_vm5 = vmpackc.low %vm658_vm3, %vm654_vm0 }
  0xab   : > { %1995 = vmatpush1.bf16.msk.msra.mxu1 %vm1994_vm5, %v2322_v61  ;;  %vm661_vm6 = vmand %vm367_vm2, %vm617_vm14  ;;  %vm370_vm2 = vcmp.eq.s32.totalorder %v241_v7, %v2529_v57  ;;  %vm368_vm5 = vcmp.eq.s32.totalorder %v240_v6, %v2544_v59  ;;  %v290_v6 = vadd.s32 480, %v2509_v21 }
  0xac   : > { %vm665_vm9 = vmand %vm371_vm4, %vm617_vm14 }
  0xad   : > { %vm1868_vm11 = vmpackc.low %vm665_vm9, %vm661_vm6 }
  0xae   : > { %1869 = vmatprep.subr.msk.bf16.mxu0 %vm1868_vm11, %v2322_v61  ;;  %vm663_vm12 = vmand %vm369_vm8, %vm619_vm1  ;;  %vm372_vm8 = vcmp.eq.s32.totalorder %v241_v7, %v2544_v59  ;;  %vm375_vm11 = vcmp.eq.s32.totalorder %v242_v9, %v2524_v53  ;;  %v291_v7 = vadd.s32 488, %v2509_v21 }
  0xaf   : > { %vm667_vm0 = vmand %vm373_vm10, %vm619_vm1 }
  0xb0   : > { %vm1996_vm3 = vmpackc.low %vm667_vm0, %vm663_vm12 }
  0xb1   : > { %1997 = vmatprep.subr.msk.bf16.mxu1 %vm1996_vm3, %v2322_v61  ;;  %vm660_vm4 = vmand %vm366_vm15, %vm616_vm7  ;;  %vm379_vm15 = vcmp.eq.s32.totalorder %v243_v11, %v2524_v53  ;;  %vm377_vm3 = vcmp.eq.s32.totalorder %v242_v9, %v2526_v54 }
  0xb2   : > { %vm664_vm6 = vmand %vm370_vm2, %vm616_vm7 }
  0xb3   : > { %vm1870_vm9 = vmpackc.low %vm664_vm6, %vm660_vm4 }
  0xb4   : > { %1871 = vmatpush1.bf16.msk.msra.mxu0 %vm1870_vm9, %v2322_v61  ;;  %vm662_vm10 = vmand %vm368_vm5, %vm618_vm13  ;;  %vm381_vm5 = vcmp.eq.s32.totalorder %v243_v11, %v2526_v54  ;;  %vm374_vm9 = vcmp.eq.s32.totalorder %v242_v9, %v2529_v57 }
  0xb5   : > { %vm666_vm12 = vmand %vm372_vm8, %vm618_vm13 }
  0xb6   : > { %vm1998_vm0 = vmpackc.low %vm666_vm12, %vm662_vm10 }
  0xb7   : > { %1999 = vmatpush1.bf16.msk.msra.mxu1 %vm1998_vm0, %v2322_v61  ;;  %vm669_vm2 = vmand %vm375_vm11, %vm617_vm14  ;;  %vm378_vm11 = vcmp.eq.s32.totalorder %v243_v11, %v2529_v57  ;;  %vm376_vm0 = vcmp.eq.s32.totalorder %v242_v9, %v2544_v59  ;;  %v293_v9 = vadd.s32 504, %v2509_v21 }
  0xb8   : > { %vm673_vm4 = vmand %vm379_vm15, %vm617_vm14 }
  0xb9   : > { %vm1872_vm6 = vmpackc.low %vm673_vm4, %vm669_vm2 }
  0xba   : > { %1873 = vmatprep.subr.msk.bf16.mxu0 %vm1872_vm6, %v2322_v61  ;;  %vm671_vm8 = vmand %vm377_vm3, %vm619_vm1  ;;  %vm380_vm3 = vcmp.eq.s32.totalorder %v243_v11, %v2544_v59  ;;  %vm383_vm6 = vcmp.eq.s32.totalorder %v244_v12, %v2524_v53 }
  0xbb   : > { %vm675_vm10 = vmand %vm381_vm5, %vm619_vm1 }
  0xbc   : > { %vm2000_vm12 = vmpackc.low %vm675_vm10, %vm671_vm8 }
  0xbd   : > { %2001 = vmatprep.subr.msk.bf16.mxu1 %vm2000_vm12, %v2322_v61  ;;  %vm668_vm15 = vmand %vm374_vm9, %vm616_vm7  ;;  %vm387_vm9 = vcmp.eq.s32.totalorder %v245_v13, %v2524_v53  ;;  %vm385_vm12 = vcmp.eq.s32.totalorder %v244_v12, %v2526_v54 }
  0xbe   : > { %vm672_vm2 = vmand %vm378_vm11, %vm616_vm7 }
  0xbf   : > { %vm1874_vm4 = vmpackc.low %vm672_vm2, %vm668_vm15 }
  0xc0   : > { %1875 = vmatpush1.bf16.msk.msra.mxu0 %vm1874_vm4, %v2322_v61  ;;  %vm670_vm5 = vmand %vm376_vm0, %vm618_vm13  ;;  %vm389_vm0 = vcmp.eq.s32.totalorder %v245_v13, %v2526_v54  ;;  %vm382_vm4 = vcmp.eq.s32.totalorder %v244_v12, %v2529_v57 }
  0xc1   : > { %vm674_vm8 = vmand %vm380_vm3, %vm618_vm13 }
  0xc2   : > { %vm2002_vm10 = vmpackc.low %vm674_vm8, %vm670_vm5 }
  0xc3   : > { %2003 = vmatpush1.bf16.msk.msra.mxu1 %vm2002_vm10, %v2322_v61  ;;  %vm677_vm11 = vmand %vm383_vm6, %vm617_vm14  ;;  %vm386_vm6 = vcmp.eq.s32.totalorder %v245_v13, %v2529_v57  ;;  %vm384_vm10 = vcmp.eq.s32.totalorder %v244_v12, %v2544_v59 }
  0xc4   : > { %vm681_vm15 = vmand %vm387_vm9, %vm617_vm14 }
  0xc5   : > { %vm1876_vm2 = vmpackc.low %vm681_vm15, %vm677_vm11 }
  0xc6   : > { %1877 = vmatprep.subr.msk.bf16.mxu0 %vm1876_vm2, %v2322_v61  ;;  %vm679_vm3 = vmand %vm385_vm12, %vm619_vm1  ;;  %vm388_vm12 = vcmp.eq.s32.totalorder %v245_v13, %v2544_v59  ;;  %vm391_vm2 = vcmp.eq.s32.totalorder %v246_v14, %v2524_v53 }
  0xc7   : > { %vm683_vm5 = vmand %vm389_vm0, %vm619_vm1 }
  0xc8   : > { %vm2004_vm8 = vmpackc.low %vm683_vm5, %vm679_vm3 }
  0xc9   : > { %2005 = vmatprep.subr.msk.bf16.mxu1 %vm2004_vm8, %v2322_v61  ;;  %vm676_vm9 = vmand %vm382_vm4, %vm616_vm7  ;;  %vm395_vm4 = vcmp.eq.s32.totalorder %v247_v15, %v2524_v53  ;;  %vm393_vm8 = vcmp.eq.s32.totalorder %v246_v14, %v2526_v54 }
  0xca   : > { %vm680_vm11 = vmand %vm386_vm6, %vm616_vm7 }
  0xcb   : > { %vm1878_vm15 = vmpackc.low %vm680_vm11, %vm676_vm9 }
  0xcc   : > { %1879 = vmatpush1.bf16.msk.msra.mxu0 %vm1878_vm15, %v2322_v61  ;;  %vm678_vm0 = vmand %vm384_vm10, %vm618_vm13  ;;  %vm397_vm10 = vcmp.eq.s32.totalorder %v247_v15, %v2526_v54  ;;  %vm390_vm15 = vcmp.eq.s32.totalorder %v246_v14, %v2529_v57 }
  0xcd   : > { %vm682_vm3 = vmand %vm388_vm12, %vm618_vm13 }
  0xce   : > { %vm2006_vm5 = vmpackc.low %vm682_vm3, %vm678_vm0 }
  0xcf   : > { %2007 = vmatpush1.bf16.msk.msra.mxu1 %vm2006_vm5, %v2322_v61  ;;  %vm685_vm6 = vmand %vm391_vm2, %vm617_vm14  ;;  %vm394_vm2 = vcmp.eq.s32.totalorder %v247_v15, %v2529_v57  ;;  %vm392_vm5 = vcmp.eq.s32.totalorder %v246_v14, %v2544_v59 }
  0xd0   : > { %vm689_vm9 = vmand %vm395_vm4, %vm617_vm14 }
  0xd1   : > { %vm1880_vm11 = vmpackc.low %vm689_vm9, %vm685_vm6 }
  0xd2   : > { %1881 = vmatprep.subr.msk.bf16.mxu0 %vm1880_vm11, %v2322_v61  ;;  %vm687_vm12 = vmand %vm393_vm8, %vm619_vm1  ;;  %vm396_vm8 = vcmp.eq.s32.totalorder %v247_v15, %v2544_v59  ;;  %vm399_vm11 = vcmp.eq.s32.totalorder %v248_v16, %v2524_v53 }
  0xd3   : > { %vm691_vm0 = vmand %vm397_vm10, %vm619_vm1 }
  0xd4   : > { %vm2008_vm3 = vmpackc.low %vm691_vm0, %vm687_vm12 }
  0xd5   : > { %2009 = vmatprep.subr.msk.bf16.mxu1 %vm2008_vm3, %v2322_v61  ;;  %vm684_vm4 = vmand %vm390_vm15, %vm616_vm7  ;;  %vm403_vm15 = vcmp.eq.s32.totalorder %v249_v17, %v2524_v53  ;;  %vm401_vm3 = vcmp.eq.s32.totalorder %v248_v16, %v2526_v54 }
  0xd6   : > { %vm688_vm6 = vmand %vm394_vm2, %vm616_vm7 }
  0xd7   : > { %vm1882_vm9 = vmpackc.low %vm688_vm6, %vm684_vm4 }
  0xd8   : > { %1883 = vmatpush1.bf16.msk.msra.mxu0 %vm1882_vm9, %v2322_v61  ;;  %vm686_vm10 = vmand %vm392_vm5, %vm618_vm13  ;;  %vm405_vm5 = vcmp.eq.s32.totalorder %v249_v17, %v2526_v54  ;;  %vm398_vm9 = vcmp.eq.s32.totalorder %v248_v16, %v2529_v57 }
  0xd9   : > { %vm690_vm12 = vmand %vm396_vm8, %vm618_vm13 }
  0xda   : > { %vm2010_vm0 = vmpackc.low %vm690_vm12, %vm686_vm10 }
  0xdb   : > { %2011 = vmatpush1.bf16.msk.msra.mxu1 %vm2010_vm0, %v2322_v61  ;;  %vm693_vm2 = vmand %vm399_vm11, %vm617_vm14  ;;  %vm402_vm11 = vcmp.eq.s32.totalorder %v249_v17, %v2529_v57  ;;  %vm400_vm0 = vcmp.eq.s32.totalorder %v248_v16, %v2544_v59 }
  0xdc   : > { %vm697_vm4 = vmand %vm403_vm15, %vm617_vm14 }
  0xdd   : > { %vm1884_vm6 = vmpackc.low %vm697_vm4, %vm693_vm2 }
  0xde   : > { %1885 = vmatprep.subr.msk.bf16.mxu0 %vm1884_vm6, %v2322_v61  ;;  %vm695_vm8 = vmand %vm401_vm3, %vm619_vm1  ;;  %vm404_vm3 = vcmp.eq.s32.totalorder %v249_v17, %v2544_v59  ;;  %vm407_vm6 = vcmp.eq.s32.totalorder %v250_v18, %v2524_v53 }
  0xdf   : > { %vm699_vm10 = vmand %vm405_vm5, %vm619_vm1 }
  0xe0   : > { %vm2012_vm12 = vmpackc.low %vm699_vm10, %vm695_vm8 }
  0xe1   : > { %2013 = vmatprep.subr.msk.bf16.mxu1 %vm2012_vm12, %v2322_v61  ;;  %vm692_vm15 = vmand %vm398_vm9, %vm616_vm7  ;;  %vm411_vm9 = vcmp.eq.s32.totalorder %v251_v19, %v2524_v53  ;;  %vm409_vm12 = vcmp.eq.s32.totalorder %v250_v18, %v2526_v54 }
  0xe2   : > { %vm696_vm2 = vmand %vm402_vm11, %vm616_vm7 }
  0xe3   : > { %vm1886_vm4 = vmpackc.low %vm696_vm2, %vm692_vm15 }
  0xe4   : > { %1887 = vmatpush1.bf16.msk.msra.mxu0 %vm1886_vm4, %v2322_v61  ;;  %vm694_vm5 = vmand %vm400_vm0, %vm618_vm13  ;;  %vm413_vm0 = vcmp.eq.s32.totalorder %v251_v19, %v2526_v54  ;;  %vm406_vm4 = vcmp.eq.s32.totalorder %v250_v18, %v2529_v57 }
  0xe5   : > { %vm698_vm8 = vmand %vm404_vm3, %vm618_vm13 }
  0xe6   : > { %vm2014_vm10 = vmpackc.low %vm698_vm8, %vm694_vm5 }
  0xe7   : > { %2015 = vmatpush1.bf16.msk.msra.mxu1 %vm2014_vm10, %v2322_v61  ;;  %vm701_vm11 = vmand %vm407_vm6, %vm617_vm14  ;;  %vm410_vm6 = vcmp.eq.s32.totalorder %v251_v19, %v2529_v57  ;;  %vm408_vm10 = vcmp.eq.s32.totalorder %v250_v18, %v2544_v59 }
  0xe8   : > { %vm705_vm15 = vmand %vm411_vm9, %vm617_vm14 }
  0xe9   : > { %vm1888_vm2 = vmpackc.low %vm705_vm15, %vm701_vm11 }
  0xea   : > { %1889 = vmatprep.subr.msk.bf16.mxu0 %vm1888_vm2, %v2322_v61  ;;  %vm703_vm3 = vmand %vm409_vm12, %vm619_vm1  ;;  %vm412_vm12 = vcmp.eq.s32.totalorder %v251_v19, %v2544_v59  ;;  %vm415_vm2 = vcmp.eq.s32.totalorder %v252_v20, %v2524_v53 }
  0xeb   : > { %vm707_vm5 = vmand %vm413_vm0, %vm619_vm1 }
  0xec   : > { %vm2016_vm8 = vmpackc.low %vm707_vm5, %vm703_vm3 }
  0xed   : > { %2017 = vmatprep.subr.msk.bf16.mxu1 %vm2016_vm8, %v2322_v61  ;;  %vm700_vm9 = vmand %vm406_vm4, %vm616_vm7  ;;  %vm419_vm4 = vcmp.eq.s32.totalorder %v253_v22, %v2524_v53  ;;  %vm417_vm8 = vcmp.eq.s32.totalorder %v252_v20, %v2526_v54 }
  0xee   : > { %vm704_vm11 = vmand %vm410_vm6, %vm616_vm7 }
  0xef   : > { %vm1890_vm15 = vmpackc.low %vm704_vm11, %vm700_vm9 }
  0xf0   : > { %1891 = vmatpush1.bf16.msk.msra.mxu0 %vm1890_vm15, %v2322_v61  ;;  %vm702_vm0 = vmand %vm408_vm10, %vm618_vm13  ;;  %vm421_vm10 = vcmp.eq.s32.totalorder %v253_v22, %v2526_v54  ;;  %vm414_vm15 = vcmp.eq.s32.totalorder %v252_v20, %v2529_v57 }
  0xf1   : > { %vm706_vm3 = vmand %vm412_vm12, %vm618_vm13 }
  0xf2   : > { %vm2018_vm5 = vmpackc.low %vm706_vm3, %vm702_vm0 }
  0xf3   : > { %2019 = vmatpush1.bf16.msk.msra.mxu1 %vm2018_vm5, %v2322_v61  ;;  %vm709_vm6 = vmand %vm415_vm2, %vm617_vm14  ;;  %vm418_vm2 = vcmp.eq.s32.totalorder %v253_v22, %v2529_v57  ;;  %vm416_vm5 = vcmp.eq.s32.totalorder %v252_v20, %v2544_v59 }
  0xf4   : > { %vm713_vm9 = vmand %vm419_vm4, %vm617_vm14 }
  0xf5   : > { %vm1892_vm11 = vmpackc.low %vm713_vm9, %vm709_vm6 }
  0xf6   : > { %1893 = vmatprep.subr.msk.bf16.mxu0 %vm1892_vm11, %v2322_v61  ;;  %vm711_vm12 = vmand %vm417_vm8, %vm619_vm1  ;;  %vm420_vm8 = vcmp.eq.s32.totalorder %v253_v22, %v2544_v59  ;;  %vm423_vm11 = vcmp.eq.s32.totalorder %v254_v23, %v2524_v53 }
  0xf7   : > { %vm715_vm0 = vmand %vm421_vm10, %vm619_vm1 }
  0xf8   : > { %vm2020_vm3 = vmpackc.low %vm715_vm0, %vm711_vm12 }
  0xf9   : > { %2021 = vmatprep.subr.msk.bf16.mxu1 %vm2020_vm3, %v2322_v61  ;;  %vm708_vm4 = vmand %vm414_vm15, %vm616_vm7  ;;  %vm427_vm15 = vcmp.eq.s32.totalorder %v255_v24, %v2524_v53  ;;  %vm425_vm3 = vcmp.eq.s32.totalorder %v254_v23, %v2526_v54 }
  0xfa   : > { %vm712_vm6 = vmand %vm418_vm2, %vm616_vm7 }
  0xfb   : > { %vm1894_vm9 = vmpackc.low %vm712_vm6, %vm708_vm4 }
  0xfc   : > { %1895 = vmatpush1.bf16.msk.msra.mxu0 %vm1894_vm9, %v2322_v61  ;;  %vm710_vm10 = vmand %vm416_vm5, %vm618_vm13  ;;  %vm429_vm5 = vcmp.eq.s32.totalorder %v255_v24, %v2526_v54  ;;  %vm422_vm9 = vcmp.eq.s32.totalorder %v254_v23, %v2529_v57 }
  0xfd   : > { %vm714_vm12 = vmand %vm420_vm8, %vm618_vm13 }
  0xfe   : > { %vm2022_vm0 = vmpackc.low %vm714_vm12, %vm710_vm10 }
  0xff   : > { %2023 = vmatpush1.bf16.msk.msra.mxu1 %vm2022_vm0, %v2322_v61  ;;  %vm717_vm2 = vmand %vm423_vm11, %vm617_vm14  ;;  %vm426_vm11 = vcmp.eq.s32.totalorder %v255_v24, %v2529_v57  ;;  %vm424_vm0 = vcmp.eq.s32.totalorder %v254_v23, %v2544_v59 }
 0x100   : > { %vm721_vm4 = vmand %vm427_vm15, %vm617_vm14 }
 0x101   : > { %vm1896_vm6 = vmpackc.low %vm721_vm4, %vm717_vm2 }
 0x102   : > { %1897 = vmatprep.subr.msk.bf16.mxu0 %vm1896_vm6, %v2322_v61  ;;  %vm719_vm8 = vmand %vm425_vm3, %vm619_vm1  ;;  %vm428_vm3 = vcmp.eq.s32.totalorder %v255_v24, %v2544_v59  ;;  %vm431_vm6 = vcmp.eq.s32.totalorder %v256_v25, %v2524_v53 }
 0x103   : > { %vm723_vm10 = vmand %vm429_vm5, %vm619_vm1 }
 0x104   : > { %vm2024_vm12 = vmpackc.low %vm723_vm10, %vm719_vm8 }
 0x105   : > { %2025 = vmatprep.subr.msk.bf16.mxu1 %vm2024_vm12, %v2322_v61  ;;  %vm716_vm15 = vmand %vm422_vm9, %vm616_vm7  ;;  %vm435_vm9 = vcmp.eq.s32.totalorder %v257_v26, %v2524_v53  ;;  %vm433_vm12 = vcmp.eq.s32.totalorder %v256_v25, %v2526_v54 }
 0x106   : > { %vm720_vm2 = vmand %vm426_vm11, %vm616_vm7 }
 0x107   : > { %vm1898_vm4 = vmpackc.low %vm720_vm2, %vm716_vm15 }
 0x108   : > { %1899 = vmatpush1.bf16.msk.msra.mxu0 %vm1898_vm4, %v2322_v61  ;;  %vm718_vm5 = vmand %vm424_vm0, %vm618_vm13  ;;  %vm437_vm0 = vcmp.eq.s32.totalorder %v257_v26, %v2526_v54  ;;  %vm430_vm4 = vcmp.eq.s32.totalorder %v256_v25, %v2529_v57 }
 0x109   : > { %vm722_vm8 = vmand %vm428_vm3, %vm618_vm13 }
 0x10a   : > { %vm2026_vm10 = vmpackc.low %vm722_vm8, %vm718_vm5 }
 0x10b   : > { %2027 = vmatpush1.bf16.msk.msra.mxu1 %vm2026_vm10, %v2322_v61  ;;  %vm725_vm11 = vmand %vm431_vm6, %vm617_vm14  ;;  %vm434_vm6 = vcmp.eq.s32.totalorder %v257_v26, %v2529_v57  ;;  %vm432_vm10 = vcmp.eq.s32.totalorder %v256_v25, %v2544_v59 }
 0x10c   : > { %vm729_vm15 = vmand %vm435_vm9, %vm617_vm14 }
 0x10d   : > { %vm1900_vm2 = vmpackc.low %vm729_vm15, %vm725_vm11 }
 0x10e   : > { %1901 = vmatprep.subr.msk.bf16.mxu0 %vm1900_vm2, %v2322_v61  ;;  %vm727_vm3 = vmand %vm433_vm12, %vm619_vm1  ;;  %vm436_vm12 = vcmp.eq.s32.totalorder %v257_v26, %v2544_v59  ;;  %vm439_vm2 = vcmp.eq.s32.totalorder %v258_v27, %v2524_v53 }
 0x10f   : > { %vm731_vm5 = vmand %vm437_vm0, %vm619_vm1 }
 0x110   : > { %vm2028_vm8 = vmpackc.low %vm731_vm5, %vm727_vm3 }
 0x111   : > { %2029 = vmatprep.subr.msk.bf16.mxu1 %vm2028_vm8, %v2322_v61  ;;  %vm724_vm9 = vmand %vm430_vm4, %vm616_vm7  ;;  %vm443_vm4 = vcmp.eq.s32.totalorder %v259_v28, %v2524_v53  ;;  %vm441_vm8 = vcmp.eq.s32.totalorder %v258_v27, %v2526_v54 }
 0x112   : > { %vm728_vm11 = vmand %vm434_vm6, %vm616_vm7 }
 0x113   : > { %vm1902_vm15 = vmpackc.low %vm728_vm11, %vm724_vm9 }
 0x114   : > { %1903 = vmatpush1.bf16.msk.msra.mxu0 %vm1902_vm15, %v2322_v61  ;;  %vm726_vm0 = vmand %vm432_vm10, %vm618_vm13  ;;  %vm445_vm10 = vcmp.eq.s32.totalorder %v259_v28, %v2526_v54  ;;  %vm438_vm15 = vcmp.eq.s32.totalorder %v258_v27, %v2529_v57 }
 0x115   : > { %vm730_vm3 = vmand %vm436_vm12, %vm618_vm13 }
 0x116   : > { %vm2030_vm5 = vmpackc.low %vm730_vm3, %vm726_vm0 }
 0x117   : > { %2031 = vmatpush1.bf16.msk.msra.mxu1 %vm2030_vm5, %v2322_v61  ;;  %vm733_vm6 = vmand %vm439_vm2, %vm617_vm14  ;;  %vm442_vm2 = vcmp.eq.s32.totalorder %v259_v28, %v2529_v57  ;;  %vm440_vm5 = vcmp.eq.s32.totalorder %v258_v27, %v2544_v59 }
 0x118   : > { %vm737_vm9 = vmand %vm443_vm4, %vm617_vm14 }
 0x119   : > { %vm1904_vm11 = vmpackc.low %vm737_vm9, %vm733_vm6 }
 0x11a   : > { %1905 = vmatprep.subr.msk.bf16.mxu0 %vm1904_vm11, %v2322_v61  ;;  %vm735_vm12 = vmand %vm441_vm8, %vm619_vm1  ;;  %vm444_vm8 = vcmp.eq.s32.totalorder %v259_v28, %v2544_v59  ;;  %vm447_vm11 = vcmp.eq.s32.totalorder %v260_v29, %v2524_v53 }
 0x11b   : > { %vm739_vm0 = vmand %vm445_vm10, %vm619_vm1 }
 0x11c   : > { %vm2032_vm3 = vmpackc.low %vm739_vm0, %vm735_vm12 }
 0x11d   : > { %2033 = vmatprep.subr.msk.bf16.mxu1 %vm2032_vm3, %v2322_v61  ;;  %vm732_vm4 = vmand %vm438_vm15, %vm616_vm7  ;;  %vm451_vm15 = vcmp.eq.s32.totalorder %v261_v30, %v2524_v53  ;;  %vm449_vm3 = vcmp.eq.s32.totalorder %v260_v29, %v2526_v54 }
 0x11e   : > { %vm736_vm6 = vmand %vm442_vm2, %vm616_vm7 }
 0x11f   : > { %vm1906_vm9 = vmpackc.low %vm736_vm6, %vm732_vm4 }
 0x120   : > { %1907 = vmatpush1.bf16.msk.msra.mxu0 %vm1906_vm9, %v2322_v61  ;;  %vm734_vm10 = vmand %vm440_vm5, %vm618_vm13  ;;  %vm453_vm5 = vcmp.eq.s32.totalorder %v261_v30, %v2526_v54  ;;  %vm446_vm9 = vcmp.eq.s32.totalorder %v260_v29, %v2529_v57 }
 0x121   : > { %vm738_vm12 = vmand %vm444_vm8, %vm618_vm13 }
 0x122   : > { %vm2034_vm0 = vmpackc.low %vm738_vm12, %vm734_vm10 }
 0x123   : > { %2035 = vmatpush1.bf16.msk.msra.mxu1 %vm2034_vm0, %v2322_v61  ;;  %vm741_vm2 = vmand %vm447_vm11, %vm617_vm14  ;;  %vm450_vm11 = vcmp.eq.s32.totalorder %v261_v30, %v2529_v57  ;;  %vm448_vm0 = vcmp.eq.s32.totalorder %v260_v29, %v2544_v59 }
 0x124   : > { %vm745_vm4 = vmand %vm451_vm15, %vm617_vm14 }
 0x125   : > { %vm1908_vm6 = vmpackc.low %vm745_vm4, %vm741_vm2 }
 0x126   : > { %1909 = vmatprep.subr.msk.bf16.mxu0 %vm1908_vm6, %v2322_v61  ;;  %vm743_vm8 = vmand %vm449_vm3, %vm619_vm1  ;;  %vm452_vm3 = vcmp.eq.s32.totalorder %v261_v30, %v2544_v59  ;;  %vm455_vm6 = vcmp.eq.s32.totalorder %v262_v31, %v2524_v53 }
 0x127   : > { %vm747_vm10 = vmand %vm453_vm5, %vm619_vm1 }
 0x128   : > { %vm2036_vm12 = vmpackc.low %vm747_vm10, %vm743_vm8 }
 0x129   : > { %2037 = vmatprep.subr.msk.bf16.mxu1 %vm2036_vm12, %v2322_v61  ;;  %vm740_vm15 = vmand %vm446_vm9, %vm616_vm7  ;;  %vm459_vm9 = vcmp.eq.s32.totalorder %v263_v32, %v2524_v53  ;;  %vm457_vm12 = vcmp.eq.s32.totalorder %v262_v31, %v2526_v54 }
 0x12a   : > { %vm744_vm2 = vmand %vm450_vm11, %vm616_vm7 }
 0x12b   : > { %vm1910_vm4 = vmpackc.low %vm744_vm2, %vm740_vm15 }
 0x12c   : > { %1911 = vmatpush1.bf16.msk.msra.mxu0 %vm1910_vm4, %v2322_v61  ;;  %vm742_vm5 = vmand %vm448_vm0, %vm618_vm13  ;;  %vm461_vm0 = vcmp.eq.s32.totalorder %v263_v32, %v2526_v54  ;;  %vm454_vm4 = vcmp.eq.s32.totalorder %v262_v31, %v2529_v57 }
 0x12d   : > { %vm746_vm8 = vmand %vm452_vm3, %vm618_vm13 }
 0x12e   : > { %vm2038_vm10 = vmpackc.low %vm746_vm8, %vm742_vm5 }
 0x12f   : > { %2039 = vmatpush1.bf16.msk.msra.mxu1 %vm2038_vm10, %v2322_v61  ;;  %vm749_vm11 = vmand %vm455_vm6, %vm617_vm14  ;;  %1205 = vmatmul.mubr.f32.vlgmr.msra.gmra.mrb[0].mxu0 %v2709_v8  ;;  %vm458_vm6 = vcmp.eq.s32.totalorder %v263_v32, %v2529_v57  ;;  %vm456_vm10 = vcmp.eq.s32.totalorder %v262_v31, %v2544_v59 }
 0x130   : > { %vm753_vm15 = vmand %vm459_vm9, %vm617_vm14  ;;  %1275 = vmatprep.mubr.f32.mxu0 %v1137_v44 }
 0x131   : > { %vm1912_vm2 = vmpackc.low %vm753_vm15, %vm749_vm11 }
 0x132   : > { %1913 = vmatprep.subr.msk.bf16.mxu0 %vm1912_vm2, %v2322_v61  ;;  %vm751_vm3 = vmand %vm457_vm12, %vm619_vm1  ;;  %1347 = vmatmul.mubr.f32.vlgmr.msra.gmra.mrb[0].mxu1 %v2709_v8  ;;  %vm460_vm12 = vcmp.eq.s32.totalorder %v263_v32, %v2544_v59  ;;  %vm463_vm2 = vcmp.eq.s32.totalorder %v264_v33, %v2524_v53  ;;  %v292_v8 = vadd.s32 496, %v2509_v21 }
 0x133   : > { %vm755_vm5 = vmand %vm461_vm0, %vm619_vm1  ;;  %1417 = vmatprep.mubr.f32.mxu1 %v1137_v44 }
 0x134   : > { %vm2040_vm8 = vmpackc.low %vm755_vm5, %vm751_vm3 }
 0x135   : > { %2041 = vmatprep.subr.msk.bf16.mxu1 %vm2040_vm8, %v2322_v61  ;;  %vm748_vm9 = vmand %vm454_vm4, %vm616_vm7  ;;  %vm467_vm4 = vcmp.eq.s32.totalorder %v265_v34, %v2524_v53  ;;  %vm465_vm8 = vcmp.eq.s32.totalorder %v264_v33, %v2526_v54 }
 0x136   : > { %vm752_vm11 = vmand %vm458_vm6, %vm616_vm7 }
 0x137   : > { %vm1914_vm15 = vmpackc.low %vm752_vm11, %vm748_vm9 }
 0x138   : > { %1915 = vmatpush1.bf16.msk.msra.mxu0 %vm1914_vm15, %v2322_v61  ;;  %vm750_vm0 = vmand %vm456_vm10, %vm618_vm13  ;;  %vm469_vm10 = vcmp.eq.s32.totalorder %v265_v34, %v2526_v54  ;;  %vm462_vm15 = vcmp.eq.s32.totalorder %v264_v33, %v2529_v57 }
 0x139   : > { %vm754_vm3 = vmand %vm460_vm12, %vm618_vm13 }
 0x13a   : > { %vm2042_vm5 = vmpackc.low %vm754_vm3, %vm750_vm0 }
 0x13b   : > { %2043 = vmatpush1.bf16.msk.msra.mxu1 %vm2042_vm5, %v2322_v61  ;;  %vm757_vm6 = vmand %vm463_vm2, %vm617_vm14  ;;  %vm466_vm2 = vcmp.eq.s32.totalorder %v265_v34, %v2529_v57  ;;  %vm464_vm5 = vcmp.eq.s32.totalorder %v264_v33, %v2544_v59 }
 0x13c   : > { %vm761_vm9 = vmand %vm467_vm4, %vm617_vm14 }
 0x13d   : > { %vm1916_vm11 = vmpackc.low %vm761_vm9, %vm757_vm6 }
 0x13e   : > { %1917 = vmatprep.subr.msk.bf16.mxu0 %vm1916_vm11, %v2322_v61  ;;  %vm759_vm12 = vmand %vm465_vm8, %vm619_vm1  ;;  %vm468_vm8 = vcmp.eq.s32.totalorder %v265_v34, %v2544_v59  ;;  %vm471_vm11 = vcmp.eq.s32.totalorder %v266_v35, %v2524_v53 }
 0x13f   : > { %vm763_vm0 = vmand %vm469_vm10, %vm619_vm1 }
 0x140   : > { %vm2044_vm3 = vmpackc.low %vm763_vm0, %vm759_vm12 }
 0x141   : > { %2045 = vmatprep.subr.msk.bf16.mxu1 %vm2044_vm3, %v2322_v61  ;;  %vm756_vm4 = vmand %vm462_vm15, %vm616_vm7  ;;  %vm475_vm15 = vcmp.eq.s32.totalorder %v267_v36, %v2524_v53  ;;  %vm473_vm3 = vcmp.eq.s32.totalorder %v266_v35, %v2526_v54 }
 0x142   : > { %vm760_vm6 = vmand %vm466_vm2, %vm616_vm7 }
 0x143   : > { %vm1918_vm9 = vmpackc.low %vm760_vm6, %vm756_vm4 }
 0x144   : > { %1919 = vmatpush1.bf16.msk.msra.mxu0 %vm1918_vm9, %v2322_v61  ;;  %vm758_vm10 = vmand %vm464_vm5, %vm618_vm13  ;;  %vm477_vm5 = vcmp.eq.s32.totalorder %v267_v36, %v2526_v54  ;;  %vm470_vm9 = vcmp.eq.s32.totalorder %v266_v35, %v2529_v57 }
 0x145   : > { %vm762_vm12 = vmand %vm468_vm8, %vm618_vm13 }
 0x146   : > { %vm2046_vm0 = vmpackc.low %vm762_vm12, %vm758_vm10 }
 0x147   : > { %2047 = vmatpush1.bf16.msk.msra.mxu1 %vm2046_vm0, %v2322_v61  ;;  %vm765_vm2 = vmand %vm471_vm11, %vm617_vm14  ;;  %vm474_vm11 = vcmp.eq.s32.totalorder %v267_v36, %v2529_v57  ;;  %vm472_vm0 = vcmp.eq.s32.totalorder %v266_v35, %v2544_v59 }
 0x148   : > { %vm769_vm4 = vmand %vm475_vm15, %vm617_vm14 }
 0x149   : > { %vm1920_vm6 = vmpackc.low %vm769_vm4, %vm765_vm2 }
 0x14a   : > { %1921 = vmatprep.subr.msk.bf16.mxu0 %vm1920_vm6, %v2322_v61  ;;  %vm767_vm8 = vmand %vm473_vm3, %vm619_vm1  ;;  %vm476_vm3 = vcmp.eq.s32.totalorder %v267_v36, %v2544_v59  ;;  %vm479_vm6 = vcmp.eq.s32.totalorder %v268_v37, %v2524_v53 }
 0x14b   : > { %vm771_vm10 = vmand %vm477_vm5, %vm619_vm1 }
 0x14c   : > { %vm2048_vm12 = vmpackc.low %vm771_vm10, %vm767_vm8 }
 0x14d   : > { %2049 = vmatprep.subr.msk.bf16.mxu1 %vm2048_vm12, %v2322_v61  ;;  %vm764_vm15 = vmand %vm470_vm9, %vm616_vm7  ;;  %vm483_vm9 = vcmp.eq.s32.totalorder %v269_v38, %v2524_v53  ;;  %vm481_vm12 = vcmp.eq.s32.totalorder %v268_v37, %v2526_v54 }
 0x14e   : > { %vm768_vm2 = vmand %vm474_vm11, %vm616_vm7 }
 0x14f   : > { %vm1922_vm4 = vmpackc.low %vm768_vm2, %vm764_vm15 }
 0x150   : > { %1923 = vmatpush1.bf16.msk.msra.mxu0 %vm1922_vm4, %v2322_v61  ;;  %vm766_vm5 = vmand %vm472_vm0, %vm618_vm13  ;;  %vm485_vm0 = vcmp.eq.s32.totalorder %v269_v38, %v2526_v54  ;;  %vm478_vm4 = vcmp.eq.s32.totalorder %v268_v37, %v2529_v57 }
 0x151   : > { %vm770_vm8 = vmand %vm476_vm3, %vm618_vm13 }
 0x152   : > { %vm2050_vm10 = vmpackc.low %vm770_vm8, %vm766_vm5 }
 0x153   : > { %2051 = vmatpush1.bf16.msk.msra.mxu1 %vm2050_vm10, %v2322_v61  ;;  %vm773_vm11 = vmand %vm479_vm6, %vm617_vm14  ;;  %vm482_vm6 = vcmp.eq.s32.totalorder %v269_v38, %v2529_v57  ;;  %vm480_vm10 = vcmp.eq.s32.totalorder %v268_v37, %v2544_v59 }
 0x154   : > { %vm777_vm15 = vmand %vm483_vm9, %vm617_vm14 }
 0x155   : > { %vm1924_vm2 = vmpackc.low %vm777_vm15, %vm773_vm11 }
 0x156   : > { %1925 = vmatprep.subr.msk.bf16.mxu0 %vm1924_vm2, %v2322_v61  ;;  %vm775_vm3 = vmand %vm481_vm12, %vm619_vm1  ;;  %vm484_vm12 = vcmp.eq.s32.totalorder %v269_v38, %v2544_v59  ;;  %vm487_vm2 = vcmp.eq.s32.totalorder %v270_v39, %v2524_v53 }
 0x157   : > { %vm779_vm5 = vmand %vm485_vm0, %vm619_vm1 }
 0x158   : > { %vm2052_vm8 = vmpackc.low %vm779_vm5, %vm775_vm3 }
 0x159   : > { %2053 = vmatprep.subr.msk.bf16.mxu1 %vm2052_vm8, %v2322_v61  ;;  %vm772_vm9 = vmand %vm478_vm4, %vm616_vm7  ;;  %vm491_vm4 = vcmp.eq.s32.totalorder %v271_v40, %v2524_v53  ;;  %vm489_vm8 = vcmp.eq.s32.totalorder %v270_v39, %v2526_v54 }
 0x15a   : > { %vm776_vm11 = vmand %vm482_vm6, %vm616_vm7 }
 0x15b   : > { %vm1926_vm15 = vmpackc.low %vm776_vm11, %vm772_vm9 }
 0x15c   : > { %1927 = vmatpush1.bf16.msk.msra.mxu0 %vm1926_vm15, %v2322_v61  ;;  %vm774_vm0 = vmand %vm480_vm10, %vm618_vm13  ;;  %vm493_vm10 = vcmp.eq.s32.totalorder %v271_v40, %v2526_v54  ;;  %vm486_vm15 = vcmp.eq.s32.totalorder %v270_v39, %v2529_v57 }
 0x15d   : > { %vm778_vm3 = vmand %vm484_vm12, %vm618_vm13 }
 0x15e   : > { %vm2054_vm5 = vmpackc.low %vm778_vm3, %vm774_vm0 }
 0x15f   : > { %2055 = vmatpush1.bf16.msk.msra.mxu1 %vm2054_vm5, %v2322_v61  ;;  %vm781_vm6 = vmand %vm487_vm2, %vm617_vm14  ;;  %vm490_vm2 = vcmp.eq.s32.totalorder %v271_v40, %v2529_v57  ;;  %vm488_vm5 = vcmp.eq.s32.totalorder %v270_v39, %v2544_v59 }
 0x160   : > { %vm785_vm9 = vmand %vm491_vm4, %vm617_vm14 }
 0x161   : > { %vm1928_vm11 = vmpackc.low %vm785_vm9, %vm781_vm6 }
 0x162   : > { %1929 = vmatprep.subr.msk.bf16.mxu0 %vm1928_vm11, %v2322_v61  ;;  %vm783_vm12 = vmand %vm489_vm8, %vm619_vm1  ;;  %vm492_vm8 = vcmp.eq.s32.totalorder %v271_v40, %v2544_v59  ;;  %vm495_vm11 = vcmp.eq.s32.totalorder %v272_v41, %v2524_v53 }
 0x163   : > { %vm787_vm0 = vmand %vm493_vm10, %vm619_vm1 }
 0x164   : > { %vm2056_vm3 = vmpackc.low %vm787_vm0, %vm783_vm12 }
 0x165   : > { %2057 = vmatprep.subr.msk.bf16.mxu1 %vm2056_vm3, %v2322_v61  ;;  %vm780_vm4 = vmand %vm486_vm15, %vm616_vm7  ;;  %vm499_vm15 = vcmp.eq.s32.totalorder %v273_v42, %v2524_v53  ;;  %vm497_vm3 = vcmp.eq.s32.totalorder %v272_v41, %v2526_v54 }
 0x166   : > { %vm784_vm6 = vmand %vm490_vm2, %vm616_vm7 }
 0x167   : > { %vm1930_vm9 = vmpackc.low %vm784_vm6, %vm780_vm4 }
 0x168   : > { %1931 = vmatpush1.bf16.msk.msra.mxu0 %vm1930_vm9, %v2322_v61  ;;  %vm782_vm10 = vmand %vm488_vm5, %vm618_vm13  ;;  %vm501_vm5 = vcmp.eq.s32.totalorder %v273_v42, %v2526_v54  ;;  %vm494_vm9 = vcmp.eq.s32.totalorder %v272_v41, %v2529_v57 }
 0x169   : > { %vm786_vm12 = vmand %vm492_vm8, %vm618_vm13 }
 0x16a   : > { %vm2058_vm0 = vmpackc.low %vm786_vm12, %vm782_vm10 }
 0x16b   : > { %2059 = vmatpush1.bf16.msk.msra.mxu1 %vm2058_vm0, %v2322_v61  ;;  %vm789_vm2 = vmand %vm495_vm11, %vm617_vm14  ;;  %vm498_vm11 = vcmp.eq.s32.totalorder %v273_v42, %v2529_v57  ;;  %vm496_vm0 = vcmp.eq.s32.totalorder %v272_v41, %v2544_v59 }
 0x16c   : > { %vm793_vm4 = vmand %vm499_vm15, %vm617_vm14 }
 0x16d   : > { %vm1932_vm6 = vmpackc.low %vm793_vm4, %vm789_vm2 }
 0x16e   : > { %1933 = vmatprep.subr.msk.bf16.mxu0 %vm1932_vm6, %v2322_v61  ;;  %vm791_vm8 = vmand %vm497_vm3, %vm619_vm1  ;;  %vm500_vm3 = vcmp.eq.s32.totalorder %v273_v42, %v2544_v59  ;;  %vm503_vm6 = vcmp.eq.s32.totalorder %v274_v45, %v2524_v53 }
 0x16f   : > { %vm795_vm10 = vmand %vm501_vm5, %vm619_vm1 }
 0x170   : > { %vm2060_vm12 = vmpackc.low %vm795_vm10, %vm791_vm8 }
 0x171   : > { %2061 = vmatprep.subr.msk.bf16.mxu1 %vm2060_vm12, %v2322_v61  ;;  %vm788_vm15 = vmand %vm494_vm9, %vm616_vm7  ;;  %vm507_vm9 = vcmp.eq.s32.totalorder %v275_v47, %v2524_v53  ;;  %vm505_vm12 = vcmp.eq.s32.totalorder %v274_v45, %v2526_v54 }
 0x172   : > { %vm792_vm2 = vmand %vm498_vm11, %vm616_vm7 }
 0x173   : > { %vm1934_vm4 = vmpackc.low %vm792_vm2, %vm788_vm15 }
 0x174   : > { %1935 = vmatpush1.bf16.msk.msra.mxu0 %vm1934_vm4, %v2322_v61  ;;  %vm790_vm5 = vmand %vm496_vm0, %vm618_vm13  ;;  %vm509_vm0 = vcmp.eq.s32.totalorder %v275_v47, %v2526_v54  ;;  %vm502_vm4 = vcmp.eq.s32.totalorder %v274_v45, %v2529_v57 }
 0x175   : > { %vm794_vm8 = vmand %vm500_vm3, %vm618_vm13 }
 0x176   : > { %vm2062_vm10 = vmpackc.low %vm794_vm8, %vm790_vm5 }
 0x177   : > { %2063 = vmatpush1.bf16.msk.msra.mxu1 %vm2062_vm10, %v2322_v61  ;;  %vm797_vm11 = vmand %vm503_vm6, %vm617_vm14  ;;  %vm506_vm6 = vcmp.eq.s32.totalorder %v275_v47, %v2529_v57  ;;  %vm504_vm10 = vcmp.eq.s32.totalorder %v274_v45, %v2544_v59 }
 0x178   : > { %vm801_vm15 = vmand %vm507_vm9, %vm617_vm14 }
 0x179   : > { %vm1936_vm2 = vmpackc.low %vm801_vm15, %vm797_vm11 }
 0x17a   : > { %1937 = vmatprep.subr.msk.bf16.mxu0 %vm1936_vm2, %v2322_v61  ;;  %vm799_vm3 = vmand %vm505_vm12, %vm619_vm1  ;;  %vm508_vm12 = vcmp.eq.s32.totalorder %v275_v47, %v2544_v59  ;;  %vm511_vm2 = vcmp.eq.s32.totalorder %v276_v48, %v2524_v53 }
 0x17b   : > { %vm803_vm5 = vmand %vm509_vm0, %vm619_vm1 }
 0x17c   : > { %vm2064_vm8 = vmpackc.low %vm803_vm5, %vm799_vm3 }
 0x17d   : > { %2065 = vmatprep.subr.msk.bf16.mxu1 %vm2064_vm8, %v2322_v61  ;;  %vm796_vm9 = vmand %vm502_vm4, %vm616_vm7  ;;  %vm515_vm4 = vcmp.eq.s32.totalorder %v277_v49, %v2524_v53  ;;  %vm513_vm8 = vcmp.eq.s32.totalorder %v276_v48, %v2526_v54 }
 0x17e   : > { %vm800_vm11 = vmand %vm506_vm6, %vm616_vm7 }
 0x17f   : > { %vm1938_vm15 = vmpackc.low %vm800_vm11, %vm796_vm9 }
 0x180   : > { %1939 = vmatpush1.bf16.msk.msra.mxu0 %vm1938_vm15, %v2322_v61  ;;  %vm798_vm0 = vmand %vm504_vm10, %vm618_vm13  ;;  %vm517_vm10 = vcmp.eq.s32.totalorder %v277_v49, %v2526_v54  ;;  %vm510_vm15 = vcmp.eq.s32.totalorder %v276_v48, %v2529_v57 }
 0x181   : > { %vm802_vm3 = vmand %vm508_vm12, %vm618_vm13 }
 0x182   : > { %vm2066_vm5 = vmpackc.low %vm802_vm3, %vm798_vm0 }
 0x183   : > { %2067 = vmatpush1.bf16.msk.msra.mxu1 %vm2066_vm5, %v2322_v61  ;;  %vm805_vm6 = vmand %vm511_vm2, %vm617_vm14  ;;  %vm514_vm2 = vcmp.eq.s32.totalorder %v277_v49, %v2529_v57  ;;  %vm512_vm5 = vcmp.eq.s32.totalorder %v276_v48, %v2544_v59 }
 0x184   : > { %vm809_vm9 = vmand %vm515_vm4, %vm617_vm14 }
 0x185   : > { %vm1940_vm11 = vmpackc.low %vm809_vm9, %vm805_vm6 }
 0x186   : > { %1941 = vmatprep.subr.msk.bf16.mxu0 %vm1940_vm11, %v2322_v61  ;;  %vm807_vm12 = vmand %vm513_vm8, %vm619_vm1  ;;  %vm516_vm8 = vcmp.eq.s32.totalorder %v277_v49, %v2544_v59  ;;  %vm519_vm11 = vcmp.eq.s32.totalorder %v278_v50, %v2524_v53 }
 0x187   : > { %vm811_vm0 = vmand %vm517_vm10, %vm619_vm1 }
 0x188   : > { %vm2068_vm3 = vmpackc.low %vm811_vm0, %vm807_vm12 }
 0x189   : > { %2069 = vmatprep.subr.msk.bf16.mxu1 %vm2068_vm3, %v2322_v61  ;;  %vm804_vm4 = vmand %vm510_vm15, %vm616_vm7  ;;  %vm523_vm15 = vcmp.eq.s32.totalorder %v279_v51, %v2524_v53  ;;  %vm521_vm3 = vcmp.eq.s32.totalorder %v278_v50, %v2526_v54 }
 0x18a   : > { %vm808_vm6 = vmand %vm514_vm2, %vm616_vm7 }
 0x18b   : > { %vm1942_vm9 = vmpackc.low %vm808_vm6, %vm804_vm4 }
 0x18c   : > { %1943 = vmatpush1.bf16.msk.msra.mxu0 %vm1942_vm9, %v2322_v61  ;;  %vm806_vm10 = vmand %vm512_vm5, %vm618_vm13  ;;  %vm525_vm5 = vcmp.eq.s32.totalorder %v279_v51, %v2526_v54  ;;  %vm518_vm9 = vcmp.eq.s32.totalorder %v278_v50, %v2529_v57 }
 0x18d   : > { %vm810_vm12 = vmand %vm516_vm8, %vm618_vm13 }
 0x18e   : > { %vm2070_vm0 = vmpackc.low %vm810_vm12, %vm806_vm10 }
 0x18f   : > { %2071 = vmatpush1.bf16.msk.msra.mxu1 %vm2070_vm0, %v2322_v61  ;;  %vm813_vm2 = vmand %vm519_vm11, %vm617_vm14  ;;  %vm522_vm11 = vcmp.eq.s32.totalorder %v279_v51, %v2529_v57  ;;  %vm520_vm0 = vcmp.eq.s32.totalorder %v278_v50, %v2544_v59 }
 0x190   : > { %vm817_vm4 = vmand %vm523_vm15, %vm617_vm14 }
 0x191   : > { %vm1944_vm6 = vmpackc.low %vm817_vm4, %vm813_vm2 }
 0x192   : > { %1945 = vmatprep.subr.msk.bf16.mxu0 %vm1944_vm6, %v2322_v61  ;;  %vm815_vm8 = vmand %vm521_vm3, %vm619_vm1  ;;  %vm524_vm3 = vcmp.eq.s32.totalorder %v279_v51, %v2544_v59  ;;  %vm527_vm6 = vcmp.eq.s32.totalorder %v280_v55, %v2524_v53 }
 0x193   : > { %vm819_vm10 = vmand %vm525_vm5, %vm619_vm1 }
 0x194   : > { %vm2072_vm12 = vmpackc.low %vm819_vm10, %vm815_vm8 }
 0x195   : > { %2073 = vmatprep.subr.msk.bf16.mxu1 %vm2072_vm12, %v2322_v61  ;;  %vm812_vm15 = vmand %vm518_vm9, %vm616_vm7  ;;  %vm531_vm9 = vcmp.eq.s32.totalorder %v281_v56, %v2524_v53  ;;  %vm529_vm12 = vcmp.eq.s32.totalorder %v280_v55, %v2526_v54 }
 0x196   : > { %vm816_vm2 = vmand %vm522_vm11, %vm616_vm7 }
 0x197   : > { %vm1946_vm4 = vmpackc.low %vm816_vm2, %vm812_vm15 }
 0x198   : > { %1947 = vmatpush1.bf16.msk.msra.mxu0 %vm1946_vm4, %v2322_v61  ;;  %vm814_vm5 = vmand %vm520_vm0, %vm618_vm13  ;;  %vm533_vm0 = vcmp.eq.s32.totalorder %v281_v56, %v2526_v54  ;;  %vm526_vm4 = vcmp.eq.s32.totalorder %v280_v55, %v2529_v57 }
 0x199   : > { %vm818_vm8 = vmand %vm524_vm3, %vm618_vm13 }
 0x19a   : > { %vm2074_vm10 = vmpackc.low %vm818_vm8, %vm814_vm5 }
 0x19b   : > { %2075 = vmatpush1.bf16.msk.msra.mxu1 %vm2074_vm10, %v2322_v61  ;;  %vm821_vm11 = vmand %vm527_vm6, %vm617_vm14  ;;  %vm530_vm6 = vcmp.eq.s32.totalorder %v281_v56, %v2529_v57  ;;  %vm528_vm10 = vcmp.eq.s32.totalorder %v280_v55, %v2544_v59 }
 0x19c   : > { %vm825_vm15 = vmand %vm531_vm9, %vm617_vm14 }
 0x19d   : > { %vm1948_vm2 = vmpackc.low %vm825_vm15, %vm821_vm11 }
 0x19e   : > { %1949 = vmatprep.subr.msk.bf16.mxu0 %vm1948_vm2, %v2322_v61  ;;  %vm823_vm3 = vmand %vm529_vm12, %vm619_vm1  ;;  %vm532_vm12 = vcmp.eq.s32.totalorder %v281_v56, %v2544_v59  ;;  %vm535_vm2 = vcmp.eq.s32.totalorder %v282_v62, %v2524_v53 }
 0x19f   : > { %vm827_vm5 = vmand %vm533_vm0, %vm619_vm1 }
 0x1a0   : > { %vm2076_vm8 = vmpackc.low %vm827_vm5, %vm823_vm3 }
 0x1a1   : > { %2077 = vmatprep.subr.msk.bf16.mxu1 %vm2076_vm8, %v2322_v61  ;;  %vm820_vm9 = vmand %vm526_vm4, %vm616_vm7  ;;  %vm539_vm4 = vcmp.eq.s32.totalorder %v283_v63, %v2524_v53  ;;  %vm537_vm8 = vcmp.eq.s32.totalorder %v282_v62, %v2526_v54 }
 0x1a2   : > { %vm824_vm11 = vmand %vm530_vm6, %vm616_vm7 }
 0x1a3   : > { %vm1950_vm15 = vmpackc.low %vm824_vm11, %vm820_vm9 }
 0x1a4   : > { %1951 = vmatpush1.bf16.msk.msra.mxu0 %vm1950_vm15, %v2322_v61  ;;  %vm822_vm0 = vmand %vm528_vm10, %vm618_vm13  ;;  %vm541_vm10 = vcmp.eq.s32.totalorder %v283_v63, %v2526_v54  ;;  %vm534_vm15 = vcmp.eq.s32.totalorder %v282_v62, %v2529_v57 }
 0x1a5   : > { %vm826_vm3 = vmand %vm532_vm12, %vm618_vm13 }
 0x1a6   : > { %vm2078_vm5 = vmpackc.low %vm826_vm3, %vm822_vm0 }
 0x1a7   : > { %2079 = vmatpush1.bf16.msk.msra.mxu1 %vm2078_vm5, %v2322_v61  ;;  %vm829_vm6 = vmand %vm535_vm2, %vm617_vm14  ;;  %vm538_vm2 = vcmp.eq.s32.totalorder %v283_v63, %v2529_v57  ;;  %vm536_vm5 = vcmp.eq.s32.totalorder %v282_v62, %v2544_v59 }
 0x1a8   : > { %vm833_vm9 = vmand %vm539_vm4, %vm617_vm14 }
 0x1a9   : > { %vm1952_vm11 = vmpackc.low %vm833_vm9, %vm829_vm6 }
 0x1aa   : > { %1953 = vmatprep.subr.msk.bf16.mxu0 %vm1952_vm11, %v2322_v61  ;;  %vm831_vm12 = vmand %vm537_vm8, %vm619_vm1  ;;  %vm540_vm8 = vcmp.eq.s32.totalorder %v283_v63, %v2544_v59  ;;  %vm543_vm11 = vcmp.eq.s32.totalorder %v284_v0, %v2524_v53 }
 0x1ab   : > { %vm835_vm0 = vmand %vm541_vm10, %vm619_vm1 }
 0x1ac   : > { %vm2080_vm3 = vmpackc.low %vm835_vm0, %vm831_vm12 }
 0x1ad   : > { %2081 = vmatprep.subr.msk.bf16.mxu1 %vm2080_vm3, %v2322_v61  ;;  %vm828_vm4 = vmand %vm534_vm15, %vm616_vm7  ;;  %vm547_vm15 = vcmp.eq.s32.totalorder %v285_v1, %v2524_v53  ;;  %vm545_vm3 = vcmp.eq.s32.totalorder %v284_v0, %v2526_v54 }
 0x1ae   : > { %vm832_vm6 = vmand %vm538_vm2, %vm616_vm7 }
 0x1af   : > { %vm1954_vm9 = vmpackc.low %vm832_vm6, %vm828_vm4 }
 0x1b0   : > { %1955 = vmatpush1.bf16.msk.msra.mxu0 %vm1954_vm9, %v2322_v61  ;;  %vm830_vm10 = vmand %vm536_vm5, %vm618_vm13  ;;  %vm549_vm5 = vcmp.eq.s32.totalorder %v285_v1, %v2526_v54  ;;  %vm542_vm9 = vcmp.eq.s32.totalorder %v284_v0, %v2529_v57 }
 0x1b1   : > { %vm834_vm12 = vmand %vm540_vm8, %vm618_vm13 }
 0x1b2   : > { %vm2082_vm0 = vmpackc.low %vm834_vm12, %vm830_vm10 }
 0x1b3   : > { %2083 = vmatpush1.bf16.msk.msra.mxu1 %vm2082_vm0, %v2322_v61  ;;  %vm837_vm2 = vmand %vm543_vm11, %vm617_vm14  ;;  %vm546_vm11 = vcmp.eq.s32.totalorder %v285_v1, %v2529_v57  ;;  %vm544_vm0 = vcmp.eq.s32.totalorder %v284_v0, %v2544_v59 }
 0x1b4   : > { %vm841_vm4 = vmand %vm547_vm15, %vm617_vm14 }
 0x1b5   : > { %vm1956_vm6 = vmpackc.low %vm841_vm4, %vm837_vm2 }
 0x1b6   : > { %1957 = vmatprep.subr.msk.bf16.mxu0 %vm1956_vm6, %v2322_v61  ;;  %vm839_vm8 = vmand %vm545_vm3, %vm619_vm1  ;;  %vm548_vm3 = vcmp.eq.s32.totalorder %v285_v1, %v2544_v59  ;;  %vm551_vm6 = vcmp.eq.s32.totalorder %v286_v2, %v2524_v53 }
 0x1b7   : > { %vm843_vm10 = vmand %vm549_vm5, %vm619_vm1 }
 0x1b8   : > { %vm2084_vm12 = vmpackc.low %vm843_vm10, %vm839_vm8 }
 0x1b9   : > { %2085 = vmatprep.subr.msk.bf16.mxu1 %vm2084_vm12, %v2322_v61  ;;  %vm836_vm15 = vmand %vm542_vm9, %vm616_vm7  ;;  %vm555_vm9 = vcmp.eq.s32.totalorder %v287_v3, %v2524_v53  ;;  %vm553_vm12 = vcmp.eq.s32.totalorder %v286_v2, %v2526_v54 }
 0x1ba   : > { %vm840_vm2 = vmand %vm546_vm11, %vm616_vm7 }
 0x1bb   : > { %vm1958_vm4 = vmpackc.low %vm840_vm2, %vm836_vm15 }
 0x1bc   : > { %1959 = vmatpush1.bf16.msk.msra.mxu0 %vm1958_vm4, %v2322_v61  ;;  %vm838_vm5 = vmand %vm544_vm0, %vm618_vm13  ;;  %vm557_vm0 = vcmp.eq.s32.totalorder %v287_v3, %v2526_v54  ;;  %vm550_vm4 = vcmp.eq.s32.totalorder %v286_v2, %v2529_v57 }
 0x1bd   : > { %vm842_vm8 = vmand %vm548_vm3, %vm618_vm13 }
 0x1be   : > { %vm2086_vm10 = vmpackc.low %vm842_vm8, %vm838_vm5 }
 0x1bf   : > { %2087 = vmatpush1.bf16.msk.msra.mxu1 %vm2086_vm10, %v2322_v61  ;;  %vm845_vm11 = vmand %vm551_vm6, %vm617_vm14  ;;  %vm554_vm6 = vcmp.eq.s32.totalorder %v287_v3, %v2529_v57  ;;  %vm552_vm10 = vcmp.eq.s32.totalorder %v286_v2, %v2544_v59 }
 0x1c0   : > { %vm849_vm15 = vmand %vm555_vm9, %vm617_vm14 }
 0x1c1   : > { %vm1960_vm2 = vmpackc.low %vm849_vm15, %vm845_vm11 }
 0x1c2   : > { %1961 = vmatprep.subr.msk.bf16.mxu0 %vm1960_vm2, %v2322_v61  ;;  %vm847_vm3 = vmand %vm553_vm12, %vm619_vm1  ;;  %vm556_vm12 = vcmp.eq.s32.totalorder %v287_v3, %v2544_v59  ;;  %vm559_vm2 = vcmp.eq.s32.totalorder %v288_v4, %v2524_v53 }
 0x1c3   : > { %vm851_vm5 = vmand %vm557_vm0, %vm619_vm1 }
 0x1c4   : > { %vm2088_vm8 = vmpackc.low %vm851_vm5, %vm847_vm3 }
 0x1c5   : > { %2089 = vmatprep.subr.msk.bf16.mxu1 %vm2088_vm8, %v2322_v61  ;;  %vm844_vm9 = vmand %vm550_vm4, %vm616_vm7  ;;  %vm563_vm4 = vcmp.eq.s32.totalorder %v289_v5, %v2524_v53  ;;  %vm561_vm8 = vcmp.eq.s32.totalorder %v288_v4, %v2526_v54 }
 0x1c6   : > { %vm848_vm11 = vmand %vm554_vm6, %vm616_vm7 }
 0x1c7   : > { %vm1962_vm15 = vmpackc.low %vm848_vm11, %vm844_vm9 }
 0x1c8   : > { %1963 = vmatpush1.bf16.msk.msra.mxu0 %vm1962_vm15, %v2322_v61  ;;  %vm846_vm0 = vmand %vm552_vm10, %vm618_vm13  ;;  %vm565_vm10 = vcmp.eq.s32.totalorder %v289_v5, %v2526_v54  ;;  %vm558_vm15 = vcmp.eq.s32.totalorder %v288_v4, %v2529_v57 }
 0x1c9   : > { %vm850_vm3 = vmand %vm556_vm12, %vm618_vm13 }
 0x1ca   : > { %vm2090_vm5 = vmpackc.low %vm850_vm3, %vm846_vm0 }
 0x1cb   : > { %2091 = vmatpush1.bf16.msk.msra.mxu1 %vm2090_vm5, %v2322_v61  ;;  %vm853_vm6 = vmand %vm559_vm2, %vm617_vm14  ;;  %vm562_vm2 = vcmp.eq.s32.totalorder %v289_v5, %v2529_v57  ;;  %vm560_vm5 = vcmp.eq.s32.totalorder %v288_v4, %v2544_v59 }
 0x1cc   : > { %vm857_vm9 = vmand %vm563_vm4, %vm617_vm14 }
 0x1cd   : > { %vm1964_vm11 = vmpackc.low %vm857_vm9, %vm853_vm6 }
 0x1ce   : > { %1965 = vmatprep.subr.msk.bf16.mxu0 %vm1964_vm11, %v2322_v61  ;;  %vm855_vm12 = vmand %vm561_vm8, %vm619_vm1  ;;  %vm564_vm8 = vcmp.eq.s32.totalorder %v289_v5, %v2544_v59  ;;  %vm567_vm11 = vcmp.eq.s32.totalorder %v290_v6, %v2524_v53 }
 0x1cf   : > { %vm859_vm0 = vmand %vm565_vm10, %vm619_vm1 }
 0x1d0   : > { %vm2092_vm3 = vmpackc.low %vm859_vm0, %vm855_vm12 }
 0x1d1   : > { %2093 = vmatprep.subr.msk.bf16.mxu1 %vm2092_vm3, %v2322_v61  ;;  %vm852_vm4 = vmand %vm558_vm15, %vm616_vm7  ;;  %vm571_vm15 = vcmp.eq.s32.totalorder %v291_v7, %v2524_v53  ;;  %vm569_vm3 = vcmp.eq.s32.totalorder %v290_v6, %v2526_v54 }
 0x1d2   : > { %vm856_vm6 = vmand %vm562_vm2, %vm616_vm7 }
 0x1d3   : > { %vm1966_vm9 = vmpackc.low %vm856_vm6, %vm852_vm4 }
 0x1d4   : > { %1967 = vmatpush1.bf16.msk.msra.mxu0 %vm1966_vm9, %v2322_v61  ;;  %vm854_vm10 = vmand %vm560_vm5, %vm618_vm13  ;;  %vm573_vm5 = vcmp.eq.s32.totalorder %v291_v7, %v2526_v54  ;;  %vm566_vm9 = vcmp.eq.s32.totalorder %v290_v6, %v2529_v57 }
 0x1d5   : > { %vm858_vm12 = vmand %vm564_vm8, %vm618_vm13 }
 0x1d6   : > { %vm2094_vm0 = vmpackc.low %vm858_vm12, %vm854_vm10 }
 0x1d7   : > { %2095 = vmatpush1.bf16.msk.msra.mxu1 %vm2094_vm0, %v2322_v61  ;;  %vm861_vm2 = vmand %vm567_vm11, %vm617_vm14  ;;  %vm570_vm11 = vcmp.eq.s32.totalorder %v291_v7, %v2529_v57  ;;  %vm568_vm0 = vcmp.eq.s32.totalorder %v290_v6, %v2544_v59 }
 0x1d8   : > { %vm865_vm4 = vmand %vm571_vm15, %vm617_vm14 }
 0x1d9   : > { %vm1968_vm6 = vmpackc.low %vm865_vm4, %vm861_vm2 }
 0x1da   : > { %1969 = vmatprep.subr.msk.bf16.mxu0 %vm1968_vm6, %v2322_v61  ;;  %vm863_vm8 = vmand %vm569_vm3, %vm619_vm1  ;;  %vm572_vm3 = vcmp.eq.s32.totalorder %v291_v7, %v2544_v59  ;;  %vm575_vm6 = vcmp.eq.s32.totalorder %v292_v8, %v2524_v53 }
 0x1db   : > { %vm867_vm10 = vmand %vm573_vm5, %vm619_vm1 }
 0x1dc   : > { %vm2096_vm12 = vmpackc.low %vm867_vm10, %vm863_vm8 }
 0x1dd   : > { %2097 = vmatprep.subr.msk.bf16.mxu1 %vm2096_vm12, %v2322_v61  ;;  %vm860_vm15 = vmand %vm566_vm9, %vm616_vm7  ;;  %vm579_vm9 = vcmp.eq.s32.totalorder %v293_v9, %v2524_v53  ;;  %vm577_vm12 = vcmp.eq.s32.totalorder %v292_v8, %v2526_v54 }
 0x1de   : > { %vm864_vm2 = vmand %vm570_vm11, %vm616_vm7 }
 0x1df   : > { %vm1970_vm4 = vmpackc.low %vm864_vm2, %vm860_vm15 }
 0x1e0   : > { %1971 = vmatpush1.bf16.msk.msra.mxu0 %vm1970_vm4, %v2322_v61  ;;  %vm862_vm5 = vmand %vm568_vm0, %vm618_vm13  ;;  %vm581_vm0 = vcmp.eq.s32.totalorder %v293_v9, %v2526_v54  ;;  %vm574_vm4 = vcmp.eq.s32.totalorder %v292_v8, %v2529_v57 }
 0x1e1   : > { %vm866_vm8 = vmand %vm572_vm3, %vm618_vm13 }
 0x1e2   : > { %vm2098_vm10 = vmpackc.low %vm866_vm8, %vm862_vm5 }
 0x1e3   : > { %2099 = vmatpush1.bf16.msk.msra.mxu1 %vm2098_vm10, %v2322_v61  ;;  %vm869_vm11 = vmand %vm575_vm6, %vm617_vm14  ;;  %vm578_vm6 = vcmp.eq.s32.totalorder %v293_v9, %v2529_v57 }
 0x1e4   : > { %vm873_vm15 = vmand %vm579_vm9, %vm617_vm14  ;;  %vm576_vm9 = vcmp.eq.s32.totalorder %v292_v8, %v2544_v59 }
 0x1e5   : > { %vm1972_vm2 = vmpackc.low %vm873_vm15, %vm869_vm11  ;;  %vm580_vm11 = vcmp.eq.s32.totalorder %v293_v9, %v2544_v59 }
 0x1e6   : > { %1973 = vmatprep.subr.msk.bf16.mxu0 %vm1972_vm2, %v2322_v61  ;;  %vm871_vm3 = vmand %vm577_vm12, %vm619_vm1 }
 0x1e7   : > { %vm875_vm5 = vmand %vm581_vm0, %vm619_vm1 }
 0x1e8   : > { %vm2100_vm8 = vmpackc.low %vm875_vm5, %vm871_vm3 }
 0x1e9   : > { %2101 = vmatprep.subr.msk.bf16.mxu1 %vm2100_vm8, %v2322_v61  ;;  %vm868_vm14 = vmand %vm574_vm4, %vm616_vm7 }
 0x1ea   : > { %vm872_vm10 = vmand %vm578_vm6, %vm616_vm7  ;;  %vm1424_vm7 = vcmp.lt.s32.totalorder %v2509_v21, 3 }
 0x1eb   : > { %vm1974_vm12 = vmpackc.low %vm872_vm10, %vm868_vm14 }
 0x1ec   : > { %1975 = vmatpush1.bf16.msk.msra.mxu0 %vm1974_vm12, %v2322_v61  ;;  %vm870_vm1 = vmand %vm576_vm9, %vm618_vm13 }
 0x1ed   : > { %vm874_vm15 = vmand %vm580_vm11, %vm618_vm13 }
 0x1ee   : > { %vm2102_vm0 = vmpackc.low %vm874_vm15, %vm870_vm1 }
 0x1ef   : > { %2103 = vmatpush1.bf16.msk.msra.mxu1 %vm2102_vm0, %v2322_v61  ;;  %1276 = vmatmul.mubr.f32.vlgmr.msra.gmra.mrb[0].mxu0 %v3192_v43 }
 0x1f2   : > { %1418 = vmatmul.mubr.f32.vlgmr.msra.gmra.mrb[0].mxu1 %v3192_v43 }
 0x2c2   : > { %v1277_v46 = vpop.f32.mrb[0].mxu0 }
 0x2c3   : > { %v1837_v52 = vmul.f32 -1.442695, %v1277_v46  ;;  %v1279_v53 = vpop.f32.mrb[1].mxu0  ;;  %v1449_v17 = vmax.f32 %v1277_v46, 0.0 }
 0x2c4   : > { %v1838_v54 = vmul.f32 -1.442695, %v1279_v53  ;;  %v1450_v19 = vmax.f32 %v1279_v53, 0.0 }
 0x2c5   : > { %2173 = vpow2.f32 %v1837_v52  ;;  %v1419_v57 = vpop.f32.mrb[0].mxu1 }
 0x2c6   : > { %v1839_v58 = vmul.f32 -1.442695, %v1419_v57  ;;  %2175 = vpow2.f32 %v1838_v54  ;;  %v1421_v59 = vpop.f32.mrb[1].mxu1  ;;  %v1451_v23 = vmax.f32 %v1419_v57, 0.0 }
 0x2c7   : > { %v1840_v10 = vmul.f32 -1.442695, %v1421_v59  ;;  %v1452_v27 = vmax.f32 %v1421_v59, 0.0 }
 0x2c8   : > { %2177 = vpow2.f32 %v1839_v58 }
 0x2c9   : > { %2179 = vpow2.f32 %v1840_v10 }
 0x2cf   : > { %v2174_v60 = vpop.eup %2173 }
 0x2d0   : > { %v2176_v11 = vpop.eup %2175  ;;  %v1437_v12 = vadd.f32 1.0, %v2174_v60 }
 0x2d1   : > { %v1438_v61 = vadd.f32 1.0, %v2176_v11 }
 0x2d2   : > { %v2178_v13 = vpop.eup %2177  ;;  %2181 = vrcp.f32 %v1437_v12 }
 0x2d3   : > { %v2180_v14 = vpop.eup %2179  ;;  %v1439_v15 = vadd.f32 1.0, %v2178_v13  ;;  %2183 = vrcp.f32 %v1438_v61 }
 0x2d4   : > { %v1440_v16 = vadd.f32 1.0, %v2180_v14 }
 0x2d5   : > { %2185 = vrcp.f32 %v1439_v15 }
 0x2d6   : > { %2187 = vrcp.f32 %v1440_v16 }
 0x2dc   : > { %v2182_v18 = vpop.eup %2181 }
 0x2dd   : > { %v2184_v20 = vpop.eup %2183  ;;  %v1453_v22 = vsel %vm1424_vm7, %v2182_v18, %v1449_v17 }
 0x2de   : > { %v1454_v24 = vsel %vm1424_vm7, %v2184_v20, %v1450_v19 }
 0x2df   : > { %v2186_v25 = vpop.eup %2185  ;;  %v1461_v26 = vcombine.low %v1453_v22, %v1454_v24 }
 0x2e0   : > { %v2188_v28 = vpop.eup %2187  ;;  %v1455_v29 = vsel %vm1424_vm7, %v2186_v25, %v1451_v23 }
 0x2e1   : > { %v1456_v30 = vsel %vm1424_vm7, %v2188_v28, %v1452_v27  ;;  %1465 = vst [vmem:[%s172_s17] sm:$0xff] %v1461_v26 }
 0x2e2   : > { %v1462_v31 = vcombine.low %v1455_v29, %v1456_v30 }
 0x2e4   : > { %1466 = vst [vmem:[%s172_s17 + $0x8] sm:$0xff] %v1462_v31 }
 0x2e5   : > { %2260 = shalt.err (!%p2257_p9)
}
 0x2e6   : > { %s2261_s5 = scalar_lea.hbm %s3529_s27, 256  ;;  %s2265_s18 = scalar_lea.hbm %s3574_s2, 1024 }
 0x2e7   : > { %p2262_p1 = scmp.ne.s32.totalorder %s3529_s27, %s2261_s5  ;;  %p2266_p3 = scmp.lt.u32.totalorder %s3529_s27, %s3574_s2 }
 0x2e8   : > { %p2267_p10 = scmp.lt.u32.totalorder %s2265_s18, %s2261_s5  ;;  %p2269_p6 = scmp.lt.u32.totalorder %s2261_s5, %s3529_s27 }
 0x2e9   : > { %p2263_p2 = pnand %p2262_p1, %p2430_p8 }
 0x2ea   : > { %p2268_p4 = por %p2267_p10, %p2266_p3 }
 0x2eb   : > { %p2264_p7 = pneg %p2263_p2 }
 0x2ec   : > { %p2270_p11 = por %p2269_p6, %p2268_p4 }
 0x2ee   : > { %p2271_p12 = pnand %p2270_p11, %p2264_p7 }
 0x2f0   : > { %2274 = shalt.err (!%p2271_p12)
}
 0x2f1   : > { %2118 = dma.vmem_to_hbm [thread:$0]  (%p2430_p8), %s3531_s19, 256, %s3529_s27, %s1468_s13  }
 0x2f2 PF: > { %p2135_p13 = scmp.ge.s32.totalorder %s2317_s12, 2  ;;  %s1494_s25 = sand.u32 1, %s2305_s9  }
 0x2f3   : > { %p3599_p0 = scmp.ne.s32.totalorder %s3579_s16, 0  ;;  %s1495_s23 = scalar_lea.sflag [#allocation4], %s1494_s25 }
 0x2f5   : > { %p2129_p5 = pnand %p2135_p13, %p3599_p0 }
 0x2f7   : > { %2300 = dma.done.wait (!%p2129_p5), %s1495_s23, 256  }
 0x2f8   : > { %2302 = vsyncadd (!%p2129_p5), %s1495_s23, 4294967040  ;;  %p16_p9 = scmp.ge.s32.totalorder %s2386_s20, 6   ;;  %s3600_s9 = smov %s2309_s10 }
 0x2f9   : > { %s3601_s10 = smov %s2313_s11  ;;  %s3602_s11 = smov %s2422_s7 }
 0x2fa   : > { %s3603_s12 = smov %s2386_s20  ;;  %18 = sbr.rel (!%p16_p9) target bundleno = 6 (0x6), region = 77 }
 0x301   :  { %1500 = vsyncpa [#allocation3], 1 }
 0x302   :  { %1502 = vsyncpa [#allocation3 + $0x1], 1 }
 0x303   :  { %1503 = vsyncpa [#allocation6], 1 }
 0x304   :  { %1504 = vsyncpa [#allocation4], 1 }
 0x305   :  { %1506 = vsyncpa [#allocation4 + $0x1], 1 }

</bundles_post_ra>
